<compile_context>
chip_gen: v7x
topology: tpu7x:2x2x1
jax: 0.10.0
libtpu: 0.0.40
codegen_flags: <defaults>
</compile_context>

<pallas_src>
import math

import jax
import jax.numpy as jnp
from jax.experimental import pallas as pl
from jax.experimental.pallas import tpu as pltpu

# ---------------- synthetic ModelConfig ----------------
N_EMBED = 32                  # config.n_embed
N_HEADS = 4                   # config.n_attention_heads
SEQ_REC = 8                   # recurrent sequence length
SEQ_INT = 8                   # internal sequence length
BATCH = 2
RESID_GATE_MULT = 2.0         # config.resid_gate_multiplier (buffer -> runtime SMEM scalar)
LN_EPS = 1e-5                 # nn.LayerNorm default eps
HE = N_EMBED * N_HEADS        # 128  (q / ff hidden width)
OUT_FF = N_EMBED + 1          # 33   (GatedFeedForward output width)


# ---------------- wrapper + kernel ----------------
def intermediate_layer(recurrent, internal, params, resid_gate_multiplier):
    B, Sr, E = recurrent.shape
    _, Si, _ = internal.shape
    H = N_HEADS
    HEl = E * H
    S2 = Sr + Si
    ln, qkvw, qkvb, f1w, f1b, f2w, f2b = params
    scale = 1.0 / math.sqrt(E)

    def kernel(gate_ref, x_ref, ln_ref, qkvw_ref, qkvb_ref,
               f1w_ref, f1b_ref, f2w_ref, f2b_ref, out_ref):
        x = x_ref[...]                                        # (B*S2, E) raw activations
        # shared LayerNorm over every row (rec & int, all batches) in one VPU pass
        mu = jnp.mean(x, axis=-1, keepdims=True)
        var = jnp.mean(jnp.square(x - mu), axis=-1, keepdims=True)
        xn = (x - mu) * jax.lax.rsqrt(var + LN_EPS) * ln_ref[0] + ln_ref[1]
        gate_mult = gate_ref[0]                               # runtime scalar from SMEM

        # c = 0 : recurrent branch, c = 1 : internal branch.  Independent dataflow
        # inside one basic block -> the scheduler interleaves the two branches.
        for c in range(2):
            q_off = 0 if c == 0 else Sr
            Sq = Sr if c == 0 else Si

            # fused q|k|v projection of ALL rows with one (E, 3*H*E) weight.
            # (q outputs of the non-query rows are wasted MXU work -> free at <1% MXU
            #  utilization, and it halves the number of drain-dominated matmuls.)
            proj = jnp.dot(xn, qkvw_ref[c],
                           preferred_element_type=jnp.float32) + qkvb_ref[c]   # (B*S2, 3*HE)

            outs = [[None] * H for _ in range(B)]
            for b in range(B):
                base = b * S2
                q = proj[base + q_off:base + q_off + Sq, 0:HEl]                 # (Sq, HE)
                k = proj[base:base + S2, HEl:2 * HEl]                           # (S2, HE)
                v = proj[base:base + S2, 2 * HEl:3 * HEl]                       # (S2, HE)
                for h in range(H):                                              # static unroll
                    qh = q[:, h * E:(h + 1) * E]
                    kh = k[:, h * E:(h + 1) * E]
                    vh = v[:, h * E:(h + 1) * E]
                    s = jax.lax.dot_general(qh, kh, (((1,), (1,)), ((), ())),
                                            preferred_element_type=jnp.float32) * scale
                    s = s - jnp.max(s, axis=-1, keepdims=True)
                    p = jnp.exp(s)
                    denom = jnp.sum(p, axis=-1, keepdims=True)
                    # EUP approximate reciprocal + one Newton step (keeps f32 accuracy)
                    r = pl.reciprocal(denom, approx=True)
                    r = r * (2.0 - denom * r)
                    p = p * r
                    outs[b][h] = jnp.dot(p, vh, preferred_element_type=jnp.float32)  # (Sq, E)

            # heads -> feature axis (col = h*E + e), batches stacked along rows
            attn_flat = jnp.concatenate(
                [jnp.concatenate([outs[b][h] for b in range(B)], axis=0) for h in range(H)],
                axis=1)                                                          # (B*Sq, HE)

            # GatedFeedForward, fused over both batch elements
            h1 = jnp.dot(attn_flat, f1w_ref[c],
                         preferred_element_type=jnp.float32) + f1b_ref[c]
            h1 = jnp.maximum(h1, 0.0)                         # activation (ReLU assumption)
            ff = jnp.dot(h1, f2w_ref[c],
                         preferred_element_type=jnp.float32) + f2b_ref[c]        # (B*Sq, E+1)
            gate = jax.nn.sigmoid(ff[:, E:E + 1]) * gate_mult                    # (B*Sq, 1)
            resid = ff[:, :E] * gate                          # dropout == identity (eval mode)

            # residual add against the RAW activations, write this branch's rows
            for b in range(B):
                row0 = b * S2 + q_off
                out_ref[row0:row0 + Sq, :] = (x[row0:row0 + Sq, :]
                                              + resid[b * Sq:(b + 1) * Sq, :])

    # batch-major row packing: [rec_b0, int_b0, rec_b1, int_b1]  -> (B*S2, E)
    x_all = jnp.concatenate([recurrent, internal], axis=1).reshape(B * S2, E)
    gate_arr = jnp.asarray([resid_gate_multiplier], dtype=jnp.float32)

    vmem = pl.BlockSpec(memory_space=pltpu.MemorySpace.VMEM)
    smem = pl.BlockSpec(memory_space=pltpu.MemorySpace.SMEM)

    out_all = pl.pallas_call(
        kernel,
        out_shape=jax.ShapeDtypeStruct((B * S2, E), jnp.float32),
        in_specs=[smem] + [vmem] * 8,
        out_specs=vmem,
    )(gate_arr, x_all, ln, qkvw, qkvb, f1w, f1b, f2w, f2b)

    out_all = out_all.reshape(B, S2, E)
    return out_all[:, :Sr, :], out_all[:, Sr:, :]


# ---------------- deterministic parameter init (packed) ----------------
def init_params(key):
    """PyTorch-style init, packed for the kernel:
       ln   (2,1,E)       : [LayerNorm weight ; bias]
       qkvw (2,E,3*HE)    : per-branch fused [q | k | v] weight, (in, out) layout
       qkvb (2,1,3*HE)
       f1w  (2,HE,HE)   f1b (2,1,HE)
       f2w  (2,HE,E+1)  f2b (2,1,E+1)
    """
    def linear(k, fan_in, fan_out):
        k1, k2 = jax.random.split(k)
        bound = 1.0 / math.sqrt(fan_in)
        w = jax.random.uniform(k1, (fan_in, fan_out), jnp.float32, -bound, bound)
        b = jax.random.uniform(k2, (1, fan_out), jnp.float32, -bound, bound)
        return w, b

    keys = jax.random.split(key, 8)
    qkvws, qkvbs, f1ws, f1bs, f2ws, f2bs = [], [], [], [], [], []
    for br in range(2):                       # 0: recurrent branch, 1: internal branch
        kq, kkv, k1_, k2_ = keys[br * 4: br * 4 + 4]
        qw, qb = linear(kq, N_EMBED, HE)
        kvw, kvb = linear(kkv, N_EMBED, 2 * HE)   # cols 0:HE -> k, HE:2HE -> v (PyTorch order)
        w1, b1 = linear(k1_, HE, HE)
        w2, b2 = linear(k2_, HE, OUT_FF)
        qkvws.append(jnp.concatenate([qw, kvw], axis=1))      # (E, 3*HE)
        qkvbs.append(jnp.concatenate([qb, kvb], axis=1))      # (1, 3*HE)
        f1ws.append(w1); f1bs.append(b1); f2ws.append(w2); f2bs.append(b2)

    ln = jnp.stack([jnp.ones((1, N_EMBED), jnp.float32),
                    jnp.zeros((1, N_EMBED), jnp.float32)])    # (2,1,E)
    return (ln,
            jnp.stack(qkvws), jnp.stack(qkvbs),
            jnp.stack(f1ws), jnp.stack(f1bs),
            jnp.stack(f2ws), jnp.stack(f2bs))


# ---------------- pure-JAX reference (full f32 precision) ----------------
def reference(recurrent, internal, params, resid_gate_multiplier):
    ln, qkvw, qkvb, f1w, f1b, f2w, f2b = params
    HI = jax.lax.Precision.HIGHEST
    E, H, HEl = N_EMBED, N_HEADS, HE

    def lnorm(x):
        mu = x.mean(-1, keepdims=True)
        var = jnp.square(x - mu).mean(-1, keepdims=True)
        return (x - mu) * jax.lax.rsqrt(var + LN_EPS) * ln[0, 0] + ln[1, 0]

    def branch(c, xq, xext, xorig):
        Bq, Sq, _ = xq.shape
        qw, kvw = qkvw[c][:, :HEl], qkvw[c][:, HEl:]
        qb, kvb = qkvb[c, 0, :HEl], qkvb[c, 0, HEl:]
        q = jnp.einsum('bsi,io->bso', xq, qw, precision=HI) + qb
        kv_seq = jnp.concatenate([xext, xq], axis=-2)
        kv = jnp.einsum('bsi,io->bso', kv_seq, kvw, precision=HI) + kvb
        Skv = kv.shape[1]
        qh = q.reshape(Bq, Sq, H, E).transpose(0, 2, 1, 3)
        kh = kv[..., :HEl].reshape(Bq, Skv, H, E).transpose(0, 2, 1, 3)
        vh = kv[..., HEl:].reshape(Bq, Skv, H, E).transpose(0, 2, 1, 3)
        s = jnp.einsum('bhqe,bhke->bhqk', qh, kh, precision=HI) / math.sqrt(E)
        p = jax.nn.softmax(s, axis=-1)
        a = jnp.einsum('bhqk,bhke->bhqe', p, vh, precision=HI)
        a = a.transpose(0, 2, 1, 3).reshape(Bq, Sq, HEl)
        h1 = jnp.maximum(jnp.einsum('bsi,io->bso', a, f1w[c], precision=HI) + f1b[c, 0], 0.0)
        out = jnp.einsum('bsi,io->bso', h1, f2w[c], precision=HI) + f2b[c, 0]
        gate = jax.nn.sigmoid(out[..., -1:]) * resid_gate_multiplier
        return xorig + out[..., :E] * gate

    rn, inn = lnorm(recurrent), lnorm(internal)
    return (branch(0, rn, inn, recurrent),
            branch(1, inn, rn, internal))


if __name__ == "__main__":
    key = jax.random.PRNGKey(0)
    k_rec, k_int, k_par = jax.random.split(key, 3)
    recurrent = jax.random.normal(k_rec, (BATCH, SEQ_REC, N_EMBED), jnp.float32)
    internal = jax.random.normal(k_int, (BATCH, SEQ_INT, N_EMBED), jnp.float32)
    params = init_params(k_par)

    out_rec, out_int = intermediate_layer(recurrent, internal, params, RESID_GATE_MULT)
    jax.block_until_ready((out_rec, out_int))

    ref_rec, ref_int = reference(recurrent, internal, params, RESID_GATE_MULT)
    assert out_rec.shape == (BATCH, SEQ_REC, N_EMBED)
    assert out_int.shape == (BATCH, SEQ_INT, N_EMBED)
    # All-f32 path; tolerance tightened 10x vs previous version.  Remaining slack covers
    # EUP transcendental / accumulation-order differences, not layout.
    assert jnp.allclose(out_rec, ref_rec, rtol=1e-3, atol=1e-3), "recurrent output mismatch"
    assert jnp.allclose(out_int, ref_int, rtol=1e-3, atol=1e-3), "internal output mismatch"

    print("KERNEL_OK")
</pallas_src>

<mosaic_0001>
module attributes {stable_mosaic.version = 11 : i64} {
  func.func @kernel(%arg0: memref<1xf32, #tpu.memory_space<smem>>, %arg1: memref<32x32xf32, #tpu.memory_space<vmem>>, %arg2: memref<2x1x32xf32, #tpu.memory_space<vmem>>, %arg3: memref<2x32x384xf32, #tpu.memory_space<vmem>>, %arg4: memref<2x1x384xf32, #tpu.memory_space<vmem>>, %arg5: memref<2x128x128xf32, #tpu.memory_space<vmem>>, %arg6: memref<2x1x128xf32, #tpu.memory_space<vmem>>, %arg7: memref<2x128x33xf32, #tpu.memory_space<vmem>>, %arg8: memref<2x1x33xf32, #tpu.memory_space<vmem>>, %arg9: memref<32x32xf32, #tpu.memory_space<vmem>>) attributes {dimension_semantics = [], scalar_prefetch = 0 : i64, scratch_operands = 0 : i64, tpu.core_type = #tpu.core_type<tc>} {
    %c0 = arith.constant 0 : index
    %c0_0 = arith.constant 0 : index
    %0 = vector.load %arg1[%c0, %c0_0] : memref<32x32xf32, #tpu.memory_space<vmem>>, vector<32x32xf32>
    %cst = arith.constant dense<0.000000e+00> : vector<32xf32>
    %1 = vector.multi_reduction <add>, %0, %cst [1] : vector<32x32xf32> to vector<32xf32>
    %2 = vector.shape_cast %1 : vector<32xf32> to vector<32x1xf32>
    %cst_1 = arith.constant 3.200000e+01 : f32
    %3 = vector.broadcast %cst_1 : f32 to vector<32x1xf32>
    %4 = arith.divf %2, %3 : vector<32x1xf32>
    %5 = vector.broadcast %4 : vector<32x1xf32> to vector<32x32xf32>
    %6 = arith.subf %0, %5 : vector<32x32xf32>
    %7 = arith.mulf %6, %6 : vector<32x32xf32>
    %cst_2 = arith.constant dense<0.000000e+00> : vector<32xf32>
    %8 = vector.multi_reduction <add>, %7, %cst_2 [1] : vector<32x32xf32> to vector<32xf32>
    %9 = vector.shape_cast %8 : vector<32xf32> to vector<32x1xf32>
    %cst_3 = arith.constant 3.200000e+01 : f32
    %10 = vector.broadcast %cst_3 : f32 to vector<32x1xf32>
    %11 = arith.divf %9, %10 : vector<32x1xf32>
    %12 = vector.broadcast %4 : vector<32x1xf32> to vector<32x32xf32>
    %13 = arith.subf %0, %12 : vector<32x32xf32>
    %cst_4 = arith.constant 9.99999974E-6 : f32
    %14 = vector.broadcast %cst_4 : f32 to vector<32x1xf32>
    %15 = arith.addf %11, %14 : vector<32x1xf32>
    %16 = math.rsqrt %15 : vector<32x1xf32>
    %17 = vector.broadcast %16 : vector<32x1xf32> to vector<32x32xf32>
    %18 = arith.mulf %13, %17 : vector<32x32xf32>
    %c0_5 = arith.constant 0 : index
    %c0_6 = arith.constant 0 : index
    %c0_7 = arith.constant 0 : index
    %19 = vector.load %arg2[%c0_5, %c0_6, %c0_7] : memref<2x1x32xf32, #tpu.memory_space<vmem>>, vector<1x1x32xf32>
    %20 = vector.shape_cast %19 : vector<1x1x32xf32> to vector<1x32xf32>
    %21 = vector.broadcast %20 : vector<1x32xf32> to vector<32x32xf32>
    %22 = arith.mulf %18, %21 : vector<32x32xf32>
    %c1 = arith.constant 1 : index
    %c0_8 = arith.constant 0 : index
    %c0_9 = arith.constant 0 : index
    %23 = vector.load %arg2[%c1, %c0_8, %c0_9] : memref<2x1x32xf32, #tpu.memory_space<vmem>>, vector<1x1x32xf32>
    %24 = vector.shape_cast %23 : vector<1x1x32xf32> to vector<1x32xf32>
    %25 = vector.broadcast %24 : vector<1x32xf32> to vector<32x32xf32>
    %26 = arith.addf %22, %25 : vector<32x32xf32>
    %c0_10 = arith.constant 0 : index
    %27 = memref.load %arg0[%c0_10] : memref<1xf32, #tpu.memory_space<smem>>
    %c0_11 = arith.constant 0 : index
    %c0_12 = arith.constant 0 : index
    %c0_13 = arith.constant 0 : index
    %28 = vector.load %arg3[%c0_11, %c0_12, %c0_13] : memref<2x32x384xf32, #tpu.memory_space<vmem>>, vector<1x32x384xf32>
    %29 = vector.shape_cast %28 : vector<1x32x384xf32> to vector<32x384xf32>
    %cst_14 = arith.constant dense<0.000000e+00> : vector<32x384xf32>
    %30 = tpu.matmul %26, %29, %cst_14 {dimension_numbers = #tpu.dot_dimension_numbers<[1], [0], [0], [1], [0, 0, 1, 1], [], []>} : vector<32x32xf32>, vector<32x384xf32>, vector<32x384xf32> -> vector<32x384xf32>
    %c0_15 = arith.constant 0 : index
    %c0_16 = arith.constant 0 : index
    %c0_17 = arith.constant 0 : index
    %31 = vector.load %arg4[%c0_15, %c0_16, %c0_17] : memref<2x1x384xf32, #tpu.memory_space<vmem>>, vector<1x1x384xf32>
    %32 = vector.shape_cast %31 : vector<1x1x384xf32> to vector<1x384xf32>
    %33 = vector.broadcast %32 : vector<1x384xf32> to vector<32x384xf32>
    %34 = arith.addf %30, %33 : vector<32x384xf32>
    %35 = vector.extract_strided_slice %34 {offsets = [0, 0], sizes = [8, 128], strides = [1, 1]} : vector<32x384xf32> to vector<8x128xf32>
    %36 = vector.extract_strided_slice %34 {offsets = [0, 128], sizes = [16, 128], strides = [1, 1]} : vector<32x384xf32> to vector<16x128xf32>
    %37 = vector.extract_strided_slice %34 {offsets = [0, 256], sizes = [16, 128], strides = [1, 1]} : vector<32x384xf32> to vector<16x128xf32>
    %38 = vector.extract_strided_slice %35 {offsets = [0, 0], sizes = [8, 32], strides = [1, 1]} : vector<8x128xf32> to vector<8x32xf32>
    %39 = vector.extract_strided_slice %36 {offsets = [0, 0], sizes = [16, 32], strides = [1, 1]} : vector<16x128xf32> to vector<16x32xf32>
    %40 = vector.extract_strided_slice %37 {offsets = [0, 0], sizes = [16, 32], strides = [1, 1]} : vector<16x128xf32> to vector<16x32xf32>
    %cst_18 = arith.constant dense<0.000000e+00> : vector<8x16xf32>
    %41 = tpu.matmul %38, %39, %cst_18 {dimension_numbers = #tpu.dot_dimension_numbers<[1], [1], [0], [0], [0, 0, 1, 0], [], []>} : vector<8x32xf32>, vector<16x32xf32>, vector<8x16xf32> -> vector<8x16xf32>
    %cst_19 = arith.constant 0.176776692 : f32
    %42 = vector.broadcast %cst_19 : f32 to vector<8x16xf32>
    %43 = arith.mulf %41, %42 : vector<8x16xf32>
    %cst_20 = arith.constant dense<0xFF800000> : vector<8xf32>
    %44 = vector.multi_reduction <maximumf>, %43, %cst_20 [1] : vector<8x16xf32> to vector<8xf32>
    %45 = vector.shape_cast %44 : vector<8xf32> to vector<8x1xf32>
    %46 = vector.broadcast %45 : vector<8x1xf32> to vector<8x16xf32>
    %47 = arith.subf %43, %46 : vector<8x16xf32>
    %48 = math.exp %47 : vector<8x16xf32>
    %cst_21 = arith.constant dense<0.000000e+00> : vector<8xf32>
    %49 = vector.multi_reduction <add>, %48, %cst_21 [1] : vector<8x16xf32> to vector<8xf32>
    %50 = vector.shape_cast %49 : vector<8xf32> to vector<8x1xf32>
    %51 = tpu.reciprocal %50 {approx = true} : vector<8x1xf32> -> vector<8x1xf32>
    %52 = arith.mulf %50, %51 : vector<8x1xf32>
    %cst_22 = arith.constant 2.000000e+00 : f32
    %53 = vector.broadcast %cst_22 : f32 to vector<8x1xf32>
    %54 = arith.subf %53, %52 : vector<8x1xf32>
    %55 = arith.mulf %51, %54 : vector<8x1xf32>
    %56 = vector.broadcast %55 : vector<8x1xf32> to vector<8x16xf32>
    %57 = arith.mulf %48, %56 : vector<8x16xf32>
    %cst_23 = arith.constant dense<0.000000e+00> : vector<8x32xf32>
    %58 = tpu.matmul %57, %40, %cst_23 {dimension_numbers = #tpu.dot_dimension_numbers<[1], [0], [0], [1], [0, 0, 1, 1], [], []>} : vector<8x16xf32>, vector<16x32xf32>, vector<8x32xf32> -> vector<8x32xf32>
    %59 = vector.extract_strided_slice %35 {offsets = [0, 32], sizes = [8, 32], strides = [1, 1]} : vector<8x128xf32> to vector<8x32xf32>
    %60 = vector.extract_strided_slice %36 {offsets = [0, 32], sizes = [16, 32], strides = [1, 1]} : vector<16x128xf32> to vector<16x32xf32>
    %61 = vector.extract_strided_slice %37 {offsets = [0, 32], sizes = [16, 32], strides = [1, 1]} : vector<16x128xf32> to vector<16x32xf32>
    %cst_24 = arith.constant dense<0.000000e+00> : vector<8x16xf32>
    %62 = tpu.matmul %59, %60, %cst_24 {dimension_numbers = #tpu.dot_dimension_numbers<[1], [1], [0], [0], [0, 0, 1, 0], [], []>} : vector<8x32xf32>, vector<16x32xf32>, vector<8x16xf32> -> vector<8x16xf32>
    %cst_25 = arith.constant 0.176776692 : f32
    %63 = vector.broadcast %cst_25 : f32 to vector<8x16xf32>
    %64 = arith.mulf %62, %63 : vector<8x16xf32>
    %cst_26 = arith.constant dense<0xFF800000> : vector<8xf32>
    %65 = vector.multi_reduction <maximumf>, %64, %cst_26 [1] : vector<8x16xf32> to vector<8xf32>
    %66 = vector.shape_cast %65 : vector<8xf32> to vector<8x1xf32>
    %67 = vector.broadcast %66 : vector<8x1xf32> to vector<8x16xf32>
    %68 = arith.subf %64, %67 : vector<8x16xf32>
    %69 = math.exp %68 : vector<8x16xf32>
    %cst_27 = arith.constant dense<0.000000e+00> : vector<8xf32>
    %70 = vector.multi_reduction <add>, %69, %cst_27 [1] : vector<8x16xf32> to vector<8xf32>
    %71 = vector.shape_cast %70 : vector<8xf32> to vector<8x1xf32>
    %72 = tpu.reciprocal %71 {approx = true} : vector<8x1xf32> -> vector<8x1xf32>
    %73 = arith.mulf %71, %72 : vector<8x1xf32>
    %cst_28 = arith.constant 2.000000e+00 : f32
    %74 = vector.broadcast %cst_28 : f32 to vector<8x1xf32>
    %75 = arith.subf %74, %73 : vector<8x1xf32>
    %76 = arith.mulf %72, %75 : vector<8x1xf32>
    %77 = vector.broadcast %76 : vector<8x1xf32> to vector<8x16xf32>
    %78 = arith.mulf %69, %77 : vector<8x16xf32>
    %cst_29 = arith.constant dense<0.000000e+00> : vector<8x32xf32>
    %79 = tpu.matmul %78, %61, %cst_29 {dimension_numbers = #tpu.dot_dimension_numbers<[1], [0], [0], [1], [0, 0, 1, 1], [], []>} : vector<8x16xf32>, vector<16x32xf32>, vector<8x32xf32> -> vector<8x32xf32>
    %80 = vector.extract_strided_slice %35 {offsets = [0, 64], sizes = [8, 32], strides = [1, 1]} : vector<8x128xf32> to vector<8x32xf32>
    %81 = vector.extract_strided_slice %36 {offsets = [0, 64], sizes = [16, 32], strides = [1, 1]} : vector<16x128xf32> to vector<16x32xf32>
    %82 = vector.extract_strided_slice %37 {offsets = [0, 64], sizes = [16, 32], strides = [1, 1]} : vector<16x128xf32> to vector<16x32xf32>
    %cst_30 = arith.constant dense<0.000000e+00> : vector<8x16xf32>
    %83 = tpu.matmul %80, %81, %cst_30 {dimension_numbers = #tpu.dot_dimension_numbers<[1], [1], [0], [0], [0, 0, 1, 0], [], []>} : vector<8x32xf32>, vector<16x32xf32>, vector<8x16xf32> -> vector<8x16xf32>
    %cst_31 = arith.constant 0.176776692 : f32
    %84 = vector.broadcast %cst_31 : f32 to vector<8x16xf32>
    %85 = arith.mulf %83, %84 : vector<8x16xf32>
    %cst_32 = arith.constant dense<0xFF800000> : vector<8xf32>
    %86 = vector.multi_reduction <maximumf>, %85, %cst_32 [1] : vector<8x16xf32> to vector<8xf32>
    %87 = vector.shape_cast %86 : vector<8xf32> to vector<8x1xf32>
    %88 = vector.broadcast %87 : vector<8x1xf32> to vector<8x16xf32>
    %89 = arith.subf %85, %88 : vector<8x16xf32>
    %90 = math.exp %89 : vector<8x16xf32>
    %cst_33 = arith.constant dense<0.000000e+00> : vector<8xf32>
    %91 = vector.multi_reduction <add>, %90, %cst_33 [1] : vector<8x16xf32> to vector<8xf32>
    %92 = vector.shape_cast %91 : vector<8xf32> to vector<8x1xf32>
    %93 = tpu.reciprocal %92 {approx = true} : vector<8x1xf32> -> vector<8x1xf32>
    %94 = arith.mulf %92, %93 : vector<8x1xf32>
    %cst_34 = arith.constant 2.000000e+00 : f32
    %95 = vector.broadcast %cst_34 : f32 to vector<8x1xf32>
    %96 = arith.subf %95, %94 : vector<8x1xf32>
    %97 = arith.mulf %93, %96 : vector<8x1xf32>
    %98 = vector.broadcast %97 : vector<8x1xf32> to vector<8x16xf32>
    %99 = arith.mulf %90, %98 : vector<8x16xf32>
    %cst_35 = arith.constant dense<0.000000e+00> : vector<8x32xf32>
    %100 = tpu.matmul %99, %82, %cst_35 {dimension_numbers = #tpu.dot_dimension_numbers<[1], [0], [0], [1], [0, 0, 1, 1], [], []>} : vector<8x16xf32>, vector<16x32xf32>, vector<8x32xf32> -> vector<8x32xf32>
    %101 = vector.extract_strided_slice %35 {offsets = [0, 96], sizes = [8, 32], strides = [1, 1]} : vector<8x128xf32> to vector<8x32xf32>
    %102 = vector.extract_strided_slice %36 {offsets = [0, 96], sizes = [16, 32], strides = [1, 1]} : vector<16x128xf32> to vector<16x32xf32>
    %103 = vector.extract_strided_slice %37 {offsets = [0, 96], sizes = [16, 32], strides = [1, 1]} : vector<16x128xf32> to vector<16x32xf32>
    %cst_36 = arith.constant dense<0.000000e+00> : vector<8x16xf32>
    %104 = tpu.matmul %101, %102, %cst_36 {dimension_numbers = #tpu.dot_dimension_numbers<[1], [1], [0], [0], [0, 0, 1, 0], [], []>} : vector<8x32xf32>, vector<16x32xf32>, vector<8x16xf32> -> vector<8x16xf32>
    %cst_37 = arith.constant 0.176776692 : f32
    %105 = vector.broadcast %cst_37 : f32 to vector<8x16xf32>
    %106 = arith.mulf %104, %105 : vector<8x16xf32>
    %cst_38 = arith.constant dense<0xFF800000> : vector<8xf32>
    %107 = vector.multi_reduction <maximumf>, %106, %cst_38 [1] : vector<8x16xf32> to vector<8xf32>
    %108 = vector.shape_cast %107 : vector<8xf32> to vector<8x1xf32>
    %109 = vector.broadcast %108 : vector<8x1xf32> to vector<8x16xf32>
    %110 = arith.subf %106, %109 : vector<8x16xf32>
    %111 = math.exp %110 : vector<8x16xf32>
    %cst_39 = arith.constant dense<0.000000e+00> : vector<8xf32>
    %112 = vector.multi_reduction <add>, %111, %cst_39 [1] : vector<8x16xf32> to vector<8xf32>
    %113 = vector.shape_cast %112 : vector<8xf32> to vector<8x1xf32>
    %114 = tpu.reciprocal %113 {approx = true} : vector<8x1xf32> -> vector<8x1xf32>
    %115 = arith.mulf %113, %114 : vector<8x1xf32>
    %cst_40 = arith.constant 2.000000e+00 : f32
    %116 = vector.broadcast %cst_40 : f32 to vector<8x1xf32>
    %117 = arith.subf %116, %115 : vector<8x1xf32>
    %118 = arith.mulf %114, %117 : vector<8x1xf32>
    %119 = vector.broadcast %118 : vector<8x1xf32> to vector<8x16xf32>
    %120 = arith.mulf %111, %119 : vector<8x16xf32>
    %cst_41 = arith.constant dense<0.000000e+00> : vector<8x32xf32>
    %121 = tpu.matmul %120, %103, %cst_41 {dimension_numbers = #tpu.dot_dimension_numbers<[1], [0], [0], [1], [0, 0, 1, 1], [], []>} : vector<8x16xf32>, vector<16x32xf32>, vector<8x32xf32> -> vector<8x32xf32>
    %122 = vector.extract_strided_slice %34 {offsets = [16, 0], sizes = [8, 128], strides = [1, 1]} : vector<32x384xf32> to vector<8x128xf32>
    %123 = vector.extract_strided_slice %34 {offsets = [16, 128], sizes = [16, 128], strides = [1, 1]} : vector<32x384xf32> to vector<16x128xf32>
    %124 = vector.extract_strided_slice %34 {offsets = [16, 256], sizes = [16, 128], strides = [1, 1]} : vector<32x384xf32> to vector<16x128xf32>
    %125 = vector.extract_strided_slice %122 {offsets = [0, 0], sizes = [8, 32], strides = [1, 1]} : vector<8x128xf32> to vector<8x32xf32>
    %126 = vector.extract_strided_slice %123 {offsets = [0, 0], sizes = [16, 32], strides = [1, 1]} : vector<16x128xf32> to vector<16x32xf32>
    %127 = vector.extract_strided_slice %124 {offsets = [0, 0], sizes = [16, 32], strides = [1, 1]} : vector<16x128xf32> to vector<16x32xf32>
    %cst_42 = arith.constant dense<0.000000e+00> : vector<8x16xf32>
    %128 = tpu.matmul %125, %126, %cst_42 {dimension_numbers = #tpu.dot_dimension_numbers<[1], [1], [0], [0], [0, 0, 1, 0], [], []>} : vector<8x32xf32>, vector<16x32xf32>, vector<8x16xf32> -> vector<8x16xf32>
    %cst_43 = arith.constant 0.176776692 : f32
    %129 = vector.broadcast %cst_43 : f32 to vector<8x16xf32>
    %130 = arith.mulf %128, %129 : vector<8x16xf32>
    %cst_44 = arith.constant dense<0xFF800000> : vector<8xf32>
    %131 = vector.multi_reduction <maximumf>, %130, %cst_44 [1] : vector<8x16xf32> to vector<8xf32>
    %132 = vector.shape_cast %131 : vector<8xf32> to vector<8x1xf32>
    %133 = vector.broadcast %132 : vector<8x1xf32> to vector<8x16xf32>
    %134 = arith.subf %130, %133 : vector<8x16xf32>
    %135 = math.exp %134 : vector<8x16xf32>
    %cst_45 = arith.constant dense<0.000000e+00> : vector<8xf32>
    %136 = vector.multi_reduction <add>, %135, %cst_45 [1] : vector<8x16xf32> to vector<8xf32>
    %137 = vector.shape_cast %136 : vector<8xf32> to vector<8x1xf32>
    %138 = tpu.reciprocal %137 {approx = true} : vector<8x1xf32> -> vector<8x1xf32>
    %139 = arith.mulf %137, %138 : vector<8x1xf32>
    %cst_46 = arith.constant 2.000000e+00 : f32
    %140 = vector.broadcast %cst_46 : f32 to vector<8x1xf32>
    %141 = arith.subf %140, %139 : vector<8x1xf32>
    %142 = arith.mulf %138, %141 : vector<8x1xf32>
    %143 = vector.broadcast %142 : vector<8x1xf32> to vector<8x16xf32>
    %144 = arith.mulf %135, %143 : vector<8x16xf32>
    %cst_47 = arith.constant dense<0.000000e+00> : vector<8x32xf32>
    %145 = tpu.matmul %144, %127, %cst_47 {dimension_numbers = #tpu.dot_dimension_numbers<[1], [0], [0], [1], [0, 0, 1, 1], [], []>} : vector<8x16xf32>, vector<16x32xf32>, vector<8x32xf32> -> vector<8x32xf32>
    %146 = vector.extract_strided_slice %122 {offsets = [0, 32], sizes = [8, 32], strides = [1, 1]} : vector<8x128xf32> to vector<8x32xf32>
    %147 = vector.extract_strided_slice %123 {offsets = [0, 32], sizes = [16, 32], strides = [1, 1]} : vector<16x128xf32> to vector<16x32xf32>
    %148 = vector.extract_strided_slice %124 {offsets = [0, 32], sizes = [16, 32], strides = [1, 1]} : vector<16x128xf32> to vector<16x32xf32>
    %cst_48 = arith.constant dense<0.000000e+00> : vector<8x16xf32>
    %149 = tpu.matmul %146, %147, %cst_48 {dimension_numbers = #tpu.dot_dimension_numbers<[1], [1], [0], [0], [0, 0, 1, 0], [], []>} : vector<8x32xf32>, vector<16x32xf32>, vector<8x16xf32> -> vector<8x16xf32>
    %cst_49 = arith.constant 0.176776692 : f32
    %150 = vector.broadcast %cst_49 : f32 to vector<8x16xf32>
    %151 = arith.mulf %149, %150 : vector<8x16xf32>
    %cst_50 = arith.constant dense<0xFF800000> : vector<8xf32>
    %152 = vector.multi_reduction <maximumf>, %151, %cst_50 [1] : vector<8x16xf32> to vector<8xf32>
    %153 = vector.shape_cast %152 : vector<8xf32> to vector<8x1xf32>
    %154 = vector.broadcast %153 : vector<8x1xf32> to vector<8x16xf32>
    %155 = arith.subf %151, %154 : vector<8x16xf32>
    %156 = math.exp %155 : vector<8x16xf32>
    %cst_51 = arith.constant dense<0.000000e+00> : vector<8xf32>
    %157 = vector.multi_reduction <add>, %156, %cst_51 [1] : vector<8x16xf32> to vector<8xf32>
    %158 = vector.shape_cast %157 : vector<8xf32> to vector<8x1xf32>
    %159 = tpu.reciprocal %158 {approx = true} : vector<8x1xf32> -> vector<8x1xf32>
    %160 = arith.mulf %158, %159 : vector<8x1xf32>
    %cst_52 = arith.constant 2.000000e+00 : f32
    %161 = vector.broadcast %cst_52 : f32 to vector<8x1xf32>
    %162 = arith.subf %161, %160 : vector<8x1xf32>
    %163 = arith.mulf %159, %162 : vector<8x1xf32>
    %164 = vector.broadcast %163 : vector<8x1xf32> to vector<8x16xf32>
    %165 = arith.mulf %156, %164 : vector<8x16xf32>
    %cst_53 = arith.constant dense<0.000000e+00> : vector<8x32xf32>
    %166 = tpu.matmul %165, %148, %cst_53 {dimension_numbers = #tpu.dot_dimension_numbers<[1], [0], [0], [1], [0, 0, 1, 1], [], []>} : vector<8x16xf32>, vector<16x32xf32>, vector<8x32xf32> -> vector<8x32xf32>
    %167 = vector.extract_strided_slice %122 {offsets = [0, 64], sizes = [8, 32], strides = [1, 1]} : vector<8x128xf32> to vector<8x32xf32>
    %168 = vector.extract_strided_slice %123 {offsets = [0, 64], sizes = [16, 32], strides = [1, 1]} : vector<16x128xf32> to vector<16x32xf32>
    %169 = vector.extract_strided_slice %124 {offsets = [0, 64], sizes = [16, 32], strides = [1, 1]} : vector<16x128xf32> to vector<16x32xf32>
    %cst_54 = arith.constant dense<0.000000e+00> : vector<8x16xf32>
    %170 = tpu.matmul %167, %168, %cst_54 {dimension_numbers = #tpu.dot_dimension_numbers<[1], [1], [0], [0], [0, 0, 1, 0], [], []>} : vector<8x32xf32>, vector<16x32xf32>, vector<8x16xf32> -> vector<8x16xf32>
    %cst_55 = arith.constant 0.176776692 : f32
    %171 = vector.broadcast %cst_55 : f32 to vector<8x16xf32>
    %172 = arith.mulf %170, %171 : vector<8x16xf32>
    %cst_56 = arith.constant dense<0xFF800000> : vector<8xf32>
    %173 = vector.multi_reduction <maximumf>, %172, %cst_56 [1] : vector<8x16xf32> to vector<8xf32>
    %174 = vector.shape_cast %173 : vector<8xf32> to vector<8x1xf32>
    %175 = vector.broadcast %174 : vector<8x1xf32> to vector<8x16xf32>
    %176 = arith.subf %172, %175 : vector<8x16xf32>
    %177 = math.exp %176 : vector<8x16xf32>
    %cst_57 = arith.constant dense<0.000000e+00> : vector<8xf32>
    %178 = vector.multi_reduction <add>, %177, %cst_57 [1] : vector<8x16xf32> to vector<8xf32>
    %179 = vector.shape_cast %178 : vector<8xf32> to vector<8x1xf32>
    %180 = tpu.reciprocal %179 {approx = true} : vector<8x1xf32> -> vector<8x1xf32>
    %181 = arith.mulf %179, %180 : vector<8x1xf32>
    %cst_58 = arith.constant 2.000000e+00 : f32
    %182 = vector.broadcast %cst_58 : f32 to vector<8x1xf32>
    %183 = arith.subf %182, %181 : vector<8x1xf32>
    %184 = arith.mulf %180, %183 : vector<8x1xf32>
    %185 = vector.broadcast %184 : vector<8x1xf32> to vector<8x16xf32>
    %186 = arith.mulf %177, %185 : vector<8x16xf32>
    %cst_59 = arith.constant dense<0.000000e+00> : vector<8x32xf32>
    %187 = tpu.matmul %186, %169, %cst_59 {dimension_numbers = #tpu.dot_dimension_numbers<[1], [0], [0], [1], [0, 0, 1, 1], [], []>} : vector<8x16xf32>, vector<16x32xf32>, vector<8x32xf32> -> vector<8x32xf32>
    %188 = vector.extract_strided_slice %122 {offsets = [0, 96], sizes = [8, 32], strides = [1, 1]} : vector<8x128xf32> to vector<8x32xf32>
    %189 = vector.extract_strided_slice %123 {offsets = [0, 96], sizes = [16, 32], strides = [1, 1]} : vector<16x128xf32> to vector<16x32xf32>
    %190 = vector.extract_strided_slice %124 {offsets = [0, 96], sizes = [16, 32], strides = [1, 1]} : vector<16x128xf32> to vector<16x32xf32>
    %cst_60 = arith.constant dense<0.000000e+00> : vector<8x16xf32>
    %191 = tpu.matmul %188, %189, %cst_60 {dimension_numbers = #tpu.dot_dimension_numbers<[1], [1], [0], [0], [0, 0, 1, 0], [], []>} : vector<8x32xf32>, vector<16x32xf32>, vector<8x16xf32> -> vector<8x16xf32>
    %cst_61 = arith.constant 0.176776692 : f32
    %192 = vector.broadcast %cst_61 : f32 to vector<8x16xf32>
    %193 = arith.mulf %191, %192 : vector<8x16xf32>
    %cst_62 = arith.constant dense<0xFF800000> : vector<8xf32>
    %194 = vector.multi_reduction <maximumf>, %193, %cst_62 [1] : vector<8x16xf32> to vector<8xf32>
    %195 = vector.shape_cast %194 : vector<8xf32> to vector<8x1xf32>
    %196 = vector.broadcast %195 : vector<8x1xf32> to vector<8x16xf32>
    %197 = arith.subf %193, %196 : vector<8x16xf32>
    %198 = math.exp %197 : vector<8x16xf32>
    %cst_63 = arith.constant dense<0.000000e+00> : vector<8xf32>
    %199 = vector.multi_reduction <add>, %198, %cst_63 [1] : vector<8x16xf32> to vector<8xf32>
    %200 = vector.shape_cast %199 : vector<8xf32> to vector<8x1xf32>
    %201 = tpu.reciprocal %200 {approx = true} : vector<8x1xf32> -> vector<8x1xf32>
    %202 = arith.mulf %200, %201 : vector<8x1xf32>
    %cst_64 = arith.constant 2.000000e+00 : f32
    %203 = vector.broadcast %cst_64 : f32 to vector<8x1xf32>
    %204 = arith.subf %203, %202 : vector<8x1xf32>
    %205 = arith.mulf %201, %204 : vector<8x1xf32>
    %206 = vector.broadcast %205 : vector<8x1xf32> to vector<8x16xf32>
    %207 = arith.mulf %198, %206 : vector<8x16xf32>
    %cst_65 = arith.constant dense<0.000000e+00> : vector<8x32xf32>
    %208 = tpu.matmul %207, %190, %cst_65 {dimension_numbers = #tpu.dot_dimension_numbers<[1], [0], [0], [1], [0, 0, 1, 1], [], []>} : vector<8x16xf32>, vector<16x32xf32>, vector<8x32xf32> -> vector<8x32xf32>
    %209 = tpu.concatenate %58, %145 in 0 : vector<8x32xf32>, vector<8x32xf32> -> vector<16x32xf32>
    %210 = tpu.concatenate %79, %166 in 0 : vector<8x32xf32>, vector<8x32xf32> -> vector<16x32xf32>
    %211 = tpu.concatenate %100, %187 in 0 : vector<8x32xf32>, vector<8x32xf32> -> vector<16x32xf32>
    %212 = tpu.concatenate %121, %208 in 0 : vector<8x32xf32>, vector<8x32xf32> -> vector<16x32xf32>
    %213 = tpu.concatenate %209, %210, %211, %212 in 1 : vector<16x32xf32>, vector<16x32xf32>, vector<16x32xf32>, vector<16x32xf32> -> vector<16x128xf32>
    %c0_66 = arith.constant 0 : index
    %c0_67 = arith.constant 0 : index
    %c0_68 = arith.constant 0 : index
    %214 = vector.load %arg5[%c0_66, %c0_67, %c0_68] : memref<2x128x128xf32, #tpu.memory_space<vmem>>, vector<1x128x128xf32>
    %215 = vector.shape_cast %214 : vector<1x128x128xf32> to vector<128x128xf32>
    %cst_69 = arith.constant dense<0.000000e+00> : vector<16x128xf32>
    %216 = tpu.matmul %213, %215, %cst_69 {dimension_numbers = #tpu.dot_dimension_numbers<[1], [0], [0], [1], [0, 0, 1, 1], [], []>} : vector<16x128xf32>, vector<128x128xf32>, vector<16x128xf32> -> vector<16x128xf32>
    %c0_70 = arith.constant 0 : index
    %c0_71 = arith.constant 0 : index
    %c0_72 = arith.constant 0 : index
    %217 = vector.load %arg6[%c0_70, %c0_71, %c0_72] : memref<2x1x128xf32, #tpu.memory_space<vmem>>, vector<1x1x128xf32>
    %218 = vector.shape_cast %217 : vector<1x1x128xf32> to vector<1x128xf32>
    %219 = vector.broadcast %218 : vector<1x128xf32> to vector<16x128xf32>
    %220 = arith.addf %216, %219 : vector<16x128xf32>
    %cst_73 = arith.constant 0.000000e+00 : f32
    %221 = vector.broadcast %cst_73 : f32 to vector<16x128xf32>
    %222 = arith.maximumf %220, %221 : vector<16x128xf32>
    %c0_74 = arith.constant 0 : index
    %c0_75 = arith.constant 0 : index
    %c0_76 = arith.constant 0 : index
    %223 = vector.load %arg7[%c0_74, %c0_75, %c0_76] : memref<2x128x33xf32, #tpu.memory_space<vmem>>, vector<1x128x33xf32>
    %224 = vector.shape_cast %223 : vector<1x128x33xf32> to vector<128x33xf32>
    %cst_77 = arith.constant dense<0.000000e+00> : vector<16x33xf32>
    %225 = tpu.matmul %222, %224, %cst_77 {dimension_numbers = #tpu.dot_dimension_numbers<[1], [0], [0], [1], [0, 0, 1, 1], [], []>} : vector<16x128xf32>, vector<128x33xf32>, vector<16x33xf32> -> vector<16x33xf32>
    %c0_78 = arith.constant 0 : index
    %c0_79 = arith.constant 0 : index
    %c0_80 = arith.constant 0 : index
    %226 = vector.load %arg8[%c0_78, %c0_79, %c0_80] : memref<2x1x33xf32, #tpu.memory_space<vmem>>, vector<1x1x33xf32>
    %227 = vector.shape_cast %226 : vector<1x1x33xf32> to vector<1x33xf32>
    %228 = vector.broadcast %227 : vector<1x33xf32> to vector<16x33xf32>
    %229 = arith.addf %225, %228 : vector<16x33xf32>
    %230 = vector.extract_strided_slice %229 {offsets = [0, 32], sizes = [16, 1], strides = [1, 1]} : vector<16x33xf32> to vector<16x1xf32>
    %231 = arith.negf %230 : vector<16x1xf32>
    %232 = math.exp %231 : vector<16x1xf32>
    %cst_81 = arith.constant 1.000000e+00 : f32
    %233 = vector.broadcast %cst_81 : f32 to vector<16x1xf32>
    %234 = arith.addf %233, %232 : vector<16x1xf32>
    %235 = arith.divf %233, %234 : vector<16x1xf32>
    %236 = vector.broadcast %27 : f32 to vector<16x1xf32>
    %237 = arith.mulf %235, %236 : vector<16x1xf32>
    %238 = vector.extract_strided_slice %229 {offsets = [0, 0], sizes = [16, 32], strides = [1, 1]} : vector<16x33xf32> to vector<16x32xf32>
    %239 = vector.broadcast %237 : vector<16x1xf32> to vector<16x32xf32>
    %240 = arith.mulf %238, %239 : vector<16x32xf32>
    %241 = vector.extract_strided_slice %0 {offsets = [0, 0], sizes = [8, 32], strides = [1, 1]} : vector<32x32xf32> to vector<8x32xf32>
    %242 = vector.extract_strided_slice %240 {offsets = [0, 0], sizes = [8, 32], strides = [1, 1]} : vector<16x32xf32> to vector<8x32xf32>
    %243 = arith.addf %241, %242 : vector<8x32xf32>
    %c0_82 = arith.constant 0 : index
    %c0_83 = arith.constant 0 : index
    %244 = vector.load %arg9[%c0_82, %c0_83] : memref<32x32xf32, #tpu.memory_space<vmem>>, vector<8x32xf32>
    tpu.vector_store %arg9[%c0_82, %c0_83], %243 {strides = array<i32>} : memref<32x32xf32, #tpu.memory_space<vmem>>, vector<8x32xf32>,
    %245 = vector.extract_strided_slice %0 {offsets = [16, 0], sizes = [8, 32], strides = [1, 1]} : vector<32x32xf32> to vector<8x32xf32>
    %246 = vector.extract_strided_slice %240 {offsets = [8, 0], sizes = [8, 32], strides = [1, 1]} : vector<16x32xf32> to vector<8x32xf32>
    %247 = arith.addf %245, %246 : vector<8x32xf32>
    %c16 = arith.constant 16 : index
    %c0_84 = arith.constant 0 : index
    %248 = vector.load %arg9[%c16, %c0_84] : memref<32x32xf32, #tpu.memory_space<vmem>>, vector<8x32xf32>
    tpu.vector_store %arg9[%c16, %c0_84], %247 {strides = array<i32>} : memref<32x32xf32, #tpu.memory_space<vmem>>, vector<8x32xf32>,
    %c1_85 = arith.constant 1 : index
    %c0_86 = arith.constant 0 : index
    %c0_87 = arith.constant 0 : index
    %249 = vector.load %arg3[%c1_85, %c0_86, %c0_87] : memref<2x32x384xf32, #tpu.memory_space<vmem>>, vector<1x32x384xf32>
    %250 = vector.shape_cast %249 : vector<1x32x384xf32> to vector<32x384xf32>
    %cst_88 = arith.constant dense<0.000000e+00> : vector<32x384xf32>
    %251 = tpu.matmul %26, %250, %cst_88 {dimension_numbers = #tpu.dot_dimension_numbers<[1], [0], [0], [1], [0, 0, 1, 1], [], []>} : vector<32x32xf32>, vector<32x384xf32>, vector<32x384xf32> -> vector<32x384xf32>
    %c1_89 = arith.constant 1 : index
    %c0_90 = arith.constant 0 : index
    %c0_91 = arith.constant 0 : index
    %252 = vector.load %arg4[%c1_89, %c0_90, %c0_91] : memref<2x1x384xf32, #tpu.memory_space<vmem>>, vector<1x1x384xf32>
    %253 = vector.shape_cast %252 : vector<1x1x384xf32> to vector<1x384xf32>
    %254 = vector.broadcast %253 : vector<1x384xf32> to vector<32x384xf32>
    %255 = arith.addf %251, %254 : vector<32x384xf32>
    %256 = vector.extract_strided_slice %255 {offsets = [8, 0], sizes = [8, 128], strides = [1, 1]} : vector<32x384xf32> to vector<8x128xf32>
    %257 = vector.extract_strided_slice %255 {offsets = [0, 128], sizes = [16, 128], strides = [1, 1]} : vector<32x384xf32> to vector<16x128xf32>
    %258 = vector.extract_strided_slice %255 {offsets = [0, 256], sizes = [16, 128], strides = [1, 1]} : vector<32x384xf32> to vector<16x128xf32>
    %259 = vector.extract_strided_slice %256 {offsets = [0, 0], sizes = [8, 32], strides = [1, 1]} : vector<8x128xf32> to vector<8x32xf32>
    %260 = vector.extract_strided_slice %257 {offsets = [0, 0], sizes = [16, 32], strides = [1, 1]} : vector<16x128xf32> to vector<16x32xf32>
    %261 = vector.extract_strided_slice %258 {offsets = [0, 0], sizes = [16, 32], strides = [1, 1]} : vector<16x128xf32> to vector<16x32xf32>
    %cst_92 = arith.constant dense<0.000000e+00> : vector<8x16xf32>
    %262 = tpu.matmul %259, %260, %cst_92 {dimension_numbers = #tpu.dot_dimension_numbers<[1], [1], [0], [0], [0, 0, 1, 0], [], []>} : vector<8x32xf32>, vector<16x32xf32>, vector<8x16xf32> -> vector<8x16xf32>
    %cst_93 = arith.constant 0.176776692 : f32
    %263 = vector.broadcast %cst_93 : f32 to vector<8x16xf32>
    %264 = arith.mulf %262, %263 : vector<8x16xf32>
    %cst_94 = arith.constant dense<0xFF800000> : vector<8xf32>
    %265 = vector.multi_reduction <maximumf>, %264, %cst_94 [1] : vector<8x16xf32> to vector<8xf32>
    %266 = vector.shape_cast %265 : vector<8xf32> to vector<8x1xf32>
    %267 = vector.broadcast %266 : vector<8x1xf32> to vector<8x16xf32>
    %268 = arith.subf %264, %267 : vector<8x16xf32>
    %269 = math.exp %268 : vector<8x16xf32>
    %cst_95 = arith.constant dense<0.000000e+00> : vector<8xf32>
    %270 = vector.multi_reduction <add>, %269, %cst_95 [1] : vector<8x16xf32> to vector<8xf32>
    %271 = vector.shape_cast %270 : vector<8xf32> to vector<8x1xf32>
    %272 = tpu.reciprocal %271 {approx = true} : vector<8x1xf32> -> vector<8x1xf32>
    %273 = arith.mulf %271, %272 : vector<8x1xf32>
    %cst_96 = arith.constant 2.000000e+00 : f32
    %274 = vector.broadcast %cst_96 : f32 to vector<8x1xf32>
    %275 = arith.subf %274, %273 : vector<8x1xf32>
    %276 = arith.mulf %272, %275 : vector<8x1xf32>
    %277 = vector.broadcast %276 : vector<8x1xf32> to vector<8x16xf32>
    %278 = arith.mulf %269, %277 : vector<8x16xf32>
    %cst_97 = arith.constant dense<0.000000e+00> : vector<8x32xf32>
    %279 = tpu.matmul %278, %261, %cst_97 {dimension_numbers = #tpu.dot_dimension_numbers<[1], [0], [0], [1], [0, 0, 1, 1], [], []>} : vector<8x16xf32>, vector<16x32xf32>, vector<8x32xf32> -> vector<8x32xf32>
    %280 = vector.extract_strided_slice %256 {offsets = [0, 32], sizes = [8, 32], strides = [1, 1]} : vector<8x128xf32> to vector<8x32xf32>
    %281 = vector.extract_strided_slice %257 {offsets = [0, 32], sizes = [16, 32], strides = [1, 1]} : vector<16x128xf32> to vector<16x32xf32>
    %282 = vector.extract_strided_slice %258 {offsets = [0, 32], sizes = [16, 32], strides = [1, 1]} : vector<16x128xf32> to vector<16x32xf32>
    %cst_98 = arith.constant dense<0.000000e+00> : vector<8x16xf32>
    %283 = tpu.matmul %280, %281, %cst_98 {dimension_numbers = #tpu.dot_dimension_numbers<[1], [1], [0], [0], [0, 0, 1, 0], [], []>} : vector<8x32xf32>, vector<16x32xf32>, vector<8x16xf32> -> vector<8x16xf32>
    %cst_99 = arith.constant 0.176776692 : f32
    %284 = vector.broadcast %cst_99 : f32 to vector<8x16xf32>
    %285 = arith.mulf %283, %284 : vector<8x16xf32>
    %cst_100 = arith.constant dense<0xFF800000> : vector<8xf32>
    %286 = vector.multi_reduction <maximumf>, %285, %cst_100 [1] : vector<8x16xf32> to vector<8xf32>
    %287 = vector.shape_cast %286 : vector<8xf32> to vector<8x1xf32>
    %288 = vector.broadcast %287 : vector<8x1xf32> to vector<8x16xf32>
    %289 = arith.subf %285, %288 : vector<8x16xf32>
    %290 = math.exp %289 : vector<8x16xf32>
    %cst_101 = arith.constant dense<0.000000e+00> : vector<8xf32>
    %291 = vector.multi_reduction <add>, %290, %cst_101 [1] : vector<8x16xf32> to vector<8xf32>
    %292 = vector.shape_cast %291 : vector<8xf32> to vector<8x1xf32>
    %293 = tpu.reciprocal %292 {approx = true} : vector<8x1xf32> -> vector<8x1xf32>
    %294 = arith.mulf %292, %293 : vector<8x1xf32>
    %cst_102 = arith.constant 2.000000e+00 : f32
    %295 = vector.broadcast %cst_102 : f32 to vector<8x1xf32>
    %296 = arith.subf %295, %294 : vector<8x1xf32>
    %297 = arith.mulf %293, %296 : vector<8x1xf32>
    %298 = vector.broadcast %297 : vector<8x1xf32> to vector<8x16xf32>
    %299 = arith.mulf %290, %298 : vector<8x16xf32>
    %cst_103 = arith.constant dense<0.000000e+00> : vector<8x32xf32>
    %300 = tpu.matmul %299, %282, %cst_103 {dimension_numbers = #tpu.dot_dimension_numbers<[1], [0], [0], [1], [0, 0, 1, 1], [], []>} : vector<8x16xf32>, vector<16x32xf32>, vector<8x32xf32> -> vector<8x32xf32>
    %301 = vector.extract_strided_slice %256 {offsets = [0, 64], sizes = [8, 32], strides = [1, 1]} : vector<8x128xf32> to vector<8x32xf32>
    %302 = vector.extract_strided_slice %257 {offsets = [0, 64], sizes = [16, 32], strides = [1, 1]} : vector<16x128xf32> to vector<16x32xf32>
    %303 = vector.extract_strided_slice %258 {offsets = [0, 64], sizes = [16, 32], strides = [1, 1]} : vector<16x128xf32> to vector<16x32xf32>
    %cst_104 = arith.constant dense<0.000000e+00> : vector<8x16xf32>
    %304 = tpu.matmul %301, %302, %cst_104 {dimension_numbers = #tpu.dot_dimension_numbers<[1], [1], [0], [0], [0, 0, 1, 0], [], []>} : vector<8x32xf32>, vector<16x32xf32>, vector<8x16xf32> -> vector<8x16xf32>
    %cst_105 = arith.constant 0.176776692 : f32
    %305 = vector.broadcast %cst_105 : f32 to vector<8x16xf32>
    %306 = arith.mulf %304, %305 : vector<8x16xf32>
    %cst_106 = arith.constant dense<0xFF800000> : vector<8xf32>
    %307 = vector.multi_reduction <maximumf>, %306, %cst_106 [1] : vector<8x16xf32> to vector<8xf32>
    %308 = vector.shape_cast %307 : vector<8xf32> to vector<8x1xf32>
    %309 = vector.broadcast %308 : vector<8x1xf32> to vector<8x16xf32>
    %310 = arith.subf %306, %309 : vector<8x16xf32>
    %311 = math.exp %310 : vector<8x16xf32>
    %cst_107 = arith.constant dense<0.000000e+00> : vector<8xf32>
    %312 = vector.multi_reduction <add>, %311, %cst_107 [1] : vector<8x16xf32> to vector<8xf32>
    %313 = vector.shape_cast %312 : vector<8xf32> to vector<8x1xf32>
    %314 = tpu.reciprocal %313 {approx = true} : vector<8x1xf32> -> vector<8x1xf32>
    %315 = arith.mulf %313, %314 : vector<8x1xf32>
    %cst_108 = arith.constant 2.000000e+00 : f32
    %316 = vector.broadcast %cst_108 : f32 to vector<8x1xf32>
    %317 = arith.subf %316, %315 : vector<8x1xf32>
    %318 = arith.mulf %314, %317 : vector<8x1xf32>
    %319 = vector.broadcast %318 : vector<8x1xf32> to vector<8x16xf32>
    %320 = arith.mulf %311, %319 : vector<8x16xf32>
    %cst_109 = arith.constant dense<0.000000e+00> : vector<8x32xf32>
    %321 = tpu.matmul %320, %303, %cst_109 {dimension_numbers = #tpu.dot_dimension_numbers<[1], [0], [0], [1], [0, 0, 1, 1], [], []>} : vector<8x16xf32>, vector<16x32xf32>, vector<8x32xf32> -> vector<8x32xf32>
    %322 = vector.extract_strided_slice %256 {offsets = [0, 96], sizes = [8, 32], strides = [1, 1]} : vector<8x128xf32> to vector<8x32xf32>
    %323 = vector.extract_strided_slice %257 {offsets = [0, 96], sizes = [16, 32], strides = [1, 1]} : vector<16x128xf32> to vector<16x32xf32>
    %324 = vector.extract_strided_slice %258 {offsets = [0, 96], sizes = [16, 32], strides = [1, 1]} : vector<16x128xf32> to vector<16x32xf32>
    %cst_110 = arith.constant dense<0.000000e+00> : vector<8x16xf32>
    %325 = tpu.matmul %322, %323, %cst_110 {dimension_numbers = #tpu.dot_dimension_numbers<[1], [1], [0], [0], [0, 0, 1, 0], [], []>} : vector<8x32xf32>, vector<16x32xf32>, vector<8x16xf32> -> vector<8x16xf32>
    %cst_111 = arith.constant 0.176776692 : f32
    %326 = vector.broadcast %cst_111 : f32 to vector<8x16xf32>
    %327 = arith.mulf %325, %326 : vector<8x16xf32>
    %cst_112 = arith.constant dense<0xFF800000> : vector<8xf32>
    %328 = vector.multi_reduction <maximumf>, %327, %cst_112 [1] : vector<8x16xf32> to vector<8xf32>
    %329 = vector.shape_cast %328 : vector<8xf32> to vector<8x1xf32>
    %330 = vector.broadcast %329 : vector<8x1xf32> to vector<8x16xf32>
    %331 = arith.subf %327, %330 : vector<8x16xf32>
    %332 = math.exp %331 : vector<8x16xf32>
    %cst_113 = arith.constant dense<0.000000e+00> : vector<8xf32>
    %333 = vector.multi_reduction <add>, %332, %cst_113 [1] : vector<8x16xf32> to vector<8xf32>
    %334 = vector.shape_cast %333 : vector<8xf32> to vector<8x1xf32>
    %335 = tpu.reciprocal %334 {approx = true} : vector<8x1xf32> -> vector<8x1xf32>
    %336 = arith.mulf %334, %335 : vector<8x1xf32>
    %cst_114 = arith.constant 2.000000e+00 : f32
    %337 = vector.broadcast %cst_114 : f32 to vector<8x1xf32>
    %338 = arith.subf %337, %336 : vector<8x1xf32>
    %339 = arith.mulf %335, %338 : vector<8x1xf32>
    %340 = vector.broadcast %339 : vector<8x1xf32> to vector<8x16xf32>
    %341 = arith.mulf %332, %340 : vector<8x16xf32>
    %cst_115 = arith.constant dense<0.000000e+00> : vector<8x32xf32>
    %342 = tpu.matmul %341, %324, %cst_115 {dimension_numbers = #tpu.dot_dimension_numbers<[1], [0], [0], [1], [0, 0, 1, 1], [], []>} : vector<8x16xf32>, vector<16x32xf32>, vector<8x32xf32> -> vector<8x32xf32>
    %343 = vector.extract_strided_slice %255 {offsets = [24, 0], sizes = [8, 128], strides = [1, 1]} : vector<32x384xf32> to vector<8x128xf32>
    %344 = vector.extract_strided_slice %255 {offsets = [16, 128], sizes = [16, 128], strides = [1, 1]} : vector<32x384xf32> to vector<16x128xf32>
    %345 = vector.extract_strided_slice %255 {offsets = [16, 256], sizes = [16, 128], strides = [1, 1]} : vector<32x384xf32> to vector<16x128xf32>
    %346 = vector.extract_strided_slice %343 {offsets = [0, 0], sizes = [8, 32], strides = [1, 1]} : vector<8x128xf32> to vector<8x32xf32>
    %347 = vector.extract_strided_slice %344 {offsets = [0, 0], sizes = [16, 32], strides = [1, 1]} : vector<16x128xf32> to vector<16x32xf32>
    %348 = vector.extract_strided_slice %345 {offsets = [0, 0], sizes = [16, 32], strides = [1, 1]} : vector<16x128xf32> to vector<16x32xf32>
    %cst_116 = arith.constant dense<0.000000e+00> : vector<8x16xf32>
    %349 = tpu.matmul %346, %347, %cst_116 {dimension_numbers = #tpu.dot_dimension_numbers<[1], [1], [0], [0], [0, 0, 1, 0], [], []>} : vector<8x32xf32>, vector<16x32xf32>, vector<8x16xf32> -> vector<8x16xf32>
    %cst_117 = arith.constant 0.176776692 : f32
    %350 = vector.broadcast %cst_117 : f32 to vector<8x16xf32>
    %351 = arith.mulf %349, %350 : vector<8x16xf32>
    %cst_118 = arith.constant dense<0xFF800000> : vector<8xf32>
    %352 = vector.multi_reduction <maximumf>, %351, %cst_118 [1] : vector<8x16xf32> to vector<8xf32>
    %353 = vector.shape_cast %352 : vector<8xf32> to vector<8x1xf32>
    %354 = vector.broadcast %353 : vector<8x1xf32> to vector<8x16xf32>
    %355 = arith.subf %351, %354 : vector<8x16xf32>
    %356 = math.exp %355 : vector<8x16xf32>
    %cst_119 = arith.constant dense<0.000000e+00> : vector<8xf32>
    %357 = vector.multi_reduction <add>, %356, %cst_119 [1] : vector<8x16xf32> to vector<8xf32>
    %358 = vector.shape_cast %357 : vector<8xf32> to vector<8x1xf32>
    %359 = tpu.reciprocal %358 {approx = true} : vector<8x1xf32> -> vector<8x1xf32>
    %360 = arith.mulf %358, %359 : vector<8x1xf32>
    %cst_120 = arith.constant 2.000000e+00 : f32
    %361 = vector.broadcast %cst_120 : f32 to vector<8x1xf32>
    %362 = arith.subf %361, %360 : vector<8x1xf32>
    %363 = arith.mulf %359, %362 : vector<8x1xf32>
    %364 = vector.broadcast %363 : vector<8x1xf32> to vector<8x16xf32>
    %365 = arith.mulf %356, %364 : vector<8x16xf32>
    %cst_121 = arith.constant dense<0.000000e+00> : vector<8x32xf32>
    %366 = tpu.matmul %365, %348, %cst_121 {dimension_numbers = #tpu.dot_dimension_numbers<[1], [0], [0], [1], [0, 0, 1, 1], [], []>} : vector<8x16xf32>, vector<16x32xf32>, vector<8x32xf32> -> vector<8x32xf32>
    %367 = vector.extract_strided_slice %343 {offsets = [0, 32], sizes = [8, 32], strides = [1, 1]} : vector<8x128xf32> to vector<8x32xf32>
    %368 = vector.extract_strided_slice %344 {offsets = [0, 32], sizes = [16, 32], strides = [1, 1]} : vector<16x128xf32> to vector<16x32xf32>
    %369 = vector.extract_strided_slice %345 {offsets = [0, 32], sizes = [16, 32], strides = [1, 1]} : vector<16x128xf32> to vector<16x32xf32>
    %cst_122 = arith.constant dense<0.000000e+00> : vector<8x16xf32>
    %370 = tpu.matmul %367, %368, %cst_122 {dimension_numbers = #tpu.dot_dimension_numbers<[1], [1], [0], [0], [0, 0, 1, 0], [], []>} : vector<8x32xf32>, vector<16x32xf32>, vector<8x16xf32> -> vector<8x16xf32>
    %cst_123 = arith.constant 0.176776692 : f32
    %371 = vector.broadcast %cst_123 : f32 to vector<8x16xf32>
    %372 = arith.mulf %370, %371 : vector<8x16xf32>
    %cst_124 = arith.constant dense<0xFF800000> : vector<8xf32>
    %373 = vector.multi_reduction <maximumf>, %372, %cst_124 [1] : vector<8x16xf32> to vector<8xf32>
    %374 = vector.shape_cast %373 : vector<8xf32> to vector<8x1xf32>
    %375 = vector.broadcast %374 : vector<8x1xf32> to vector<8x16xf32>
    %376 = arith.subf %372, %375 : vector<8x16xf32>
    %377 = math.exp %376 : vector<8x16xf32>
    %cst_125 = arith.constant dense<0.000000e+00> : vector<8xf32>
    %378 = vector.multi_reduction <add>, %377, %cst_125 [1] : vector<8x16xf32> to vector<8xf32>
    %379 = vector.shape_cast %378 : vector<8xf32> to vector<8x1xf32>
    %380 = tpu.reciprocal %379 {approx = true} : vector<8x1xf32> -> vector<8x1xf32>
    %381 = arith.mulf %379, %380 : vector<8x1xf32>
    %cst_126 = arith.constant 2.000000e+00 : f32
    %382 = vector.broadcast %cst_126 : f32 to vector<8x1xf32>
    %383 = arith.subf %382, %381 : vector<8x1xf32>
    %384 = arith.mulf %380, %383 : vector<8x1xf32>
    %385 = vector.broadcast %384 : vector<8x1xf32> to vector<8x16xf32>
    %386 = arith.mulf %377, %385 : vector<8x16xf32>
    %cst_127 = arith.constant dense<0.000000e+00> : vector<8x32xf32>
    %387 = tpu.matmul %386, %369, %cst_127 {dimension_numbers = #tpu.dot_dimension_numbers<[1], [0], [0], [1], [0, 0, 1, 1], [], []>} : vector<8x16xf32>, vector<16x32xf32>, vector<8x32xf32> -> vector<8x32xf32>
    %388 = vector.extract_strided_slice %343 {offsets = [0, 64], sizes = [8, 32], strides = [1, 1]} : vector<8x128xf32> to vector<8x32xf32>
    %389 = vector.extract_strided_slice %344 {offsets = [0, 64], sizes = [16, 32], strides = [1, 1]} : vector<16x128xf32> to vector<16x32xf32>
    %390 = vector.extract_strided_slice %345 {offsets = [0, 64], sizes = [16, 32], strides = [1, 1]} : vector<16x128xf32> to vector<16x32xf32>
    %cst_128 = arith.constant dense<0.000000e+00> : vector<8x16xf32>
    %391 = tpu.matmul %388, %389, %cst_128 {dimension_numbers = #tpu.dot_dimension_numbers<[1], [1], [0], [0], [0, 0, 1, 0], [], []>} : vector<8x32xf32>, vector<16x32xf32>, vector<8x16xf32> -> vector<8x16xf32>
    %cst_129 = arith.constant 0.176776692 : f32
    %392 = vector.broadcast %cst_129 : f32 to vector<8x16xf32>
    %393 = arith.mulf %391, %392 : vector<8x16xf32>
    %cst_130 = arith.constant dense<0xFF800000> : vector<8xf32>
    %394 = vector.multi_reduction <maximumf>, %393, %cst_130 [1] : vector<8x16xf32> to vector<8xf32>
    %395 = vector.shape_cast %394 : vector<8xf32> to vector<8x1xf32>
    %396 = vector.broadcast %395 : vector<8x1xf32> to vector<8x16xf32>
    %397 = arith.subf %393, %396 : vector<8x16xf32>
    %398 = math.exp %397 : vector<8x16xf32>
    %cst_131 = arith.constant dense<0.000000e+00> : vector<8xf32>
    %399 = vector.multi_reduction <add>, %398, %cst_131 [1] : vector<8x16xf32> to vector<8xf32>
    %400 = vector.shape_cast %399 : vector<8xf32> to vector<8x1xf32>
    %401 = tpu.reciprocal %400 {approx = true} : vector<8x1xf32> -> vector<8x1xf32>
    %402 = arith.mulf %400, %401 : vector<8x1xf32>
    %cst_132 = arith.constant 2.000000e+00 : f32
    %403 = vector.broadcast %cst_132 : f32 to vector<8x1xf32>
    %404 = arith.subf %403, %402 : vector<8x1xf32>
    %405 = arith.mulf %401, %404 : vector<8x1xf32>
    %406 = vector.broadcast %405 : vector<8x1xf32> to vector<8x16xf32>
    %407 = arith.mulf %398, %406 : vector<8x16xf32>
    %cst_133 = arith.constant dense<0.000000e+00> : vector<8x32xf32>
    %408 = tpu.matmul %407, %390, %cst_133 {dimension_numbers = #tpu.dot_dimension_numbers<[1], [0], [0], [1], [0, 0, 1, 1], [], []>} : vector<8x16xf32>, vector<16x32xf32>, vector<8x32xf32> -> vector<8x32xf32>
    %409 = vector.extract_strided_slice %343 {offsets = [0, 96], sizes = [8, 32], strides = [1, 1]} : vector<8x128xf32> to vector<8x32xf32>
    %410 = vector.extract_strided_slice %344 {offsets = [0, 96], sizes = [16, 32], strides = [1, 1]} : vector<16x128xf32> to vector<16x32xf32>
    %411 = vector.extract_strided_slice %345 {offsets = [0, 96], sizes = [16, 32], strides = [1, 1]} : vector<16x128xf32> to vector<16x32xf32>
    %cst_134 = arith.constant dense<0.000000e+00> : vector<8x16xf32>
    %412 = tpu.matmul %409, %410, %cst_134 {dimension_numbers = #tpu.dot_dimension_numbers<[1], [1], [0], [0], [0, 0, 1, 0], [], []>} : vector<8x32xf32>, vector<16x32xf32>, vector<8x16xf32> -> vector<8x16xf32>
    %cst_135 = arith.constant 0.176776692 : f32
    %413 = vector.broadcast %cst_135 : f32 to vector<8x16xf32>
    %414 = arith.mulf %412, %413 : vector<8x16xf32>
    %cst_136 = arith.constant dense<0xFF800000> : vector<8xf32>
    %415 = vector.multi_reduction <maximumf>, %414, %cst_136 [1] : vector<8x16xf32> to vector<8xf32>
    %416 = vector.shape_cast %415 : vector<8xf32> to vector<8x1xf32>
    %417 = vector.broadcast %416 : vector<8x1xf32> to vector<8x16xf32>
    %418 = arith.subf %414, %417 : vector<8x16xf32>
    %419 = math.exp %418 : vector<8x16xf32>
    %cst_137 = arith.constant dense<0.000000e+00> : vector<8xf32>
    %420 = vector.multi_reduction <add>, %419, %cst_137 [1] : vector<8x16xf32> to vector<8xf32>
    %421 = vector.shape_cast %420 : vector<8xf32> to vector<8x1xf32>
    %422 = tpu.reciprocal %421 {approx = true} : vector<8x1xf32> -> vector<8x1xf32>
    %423 = arith.mulf %421, %422 : vector<8x1xf32>
    %cst_138 = arith.constant 2.000000e+00 : f32
    %424 = vector.broadcast %cst_138 : f32 to vector<8x1xf32>
    %425 = arith.subf %424, %423 : vector<8x1xf32>
    %426 = arith.mulf %422, %425 : vector<8x1xf32>
    %427 = vector.broadcast %426 : vector<8x1xf32> to vector<8x16xf32>
    %428 = arith.mulf %419, %427 : vector<8x16xf32>
    %cst_139 = arith.constant dense<0.000000e+00> : vector<8x32xf32>
    %429 = tpu.matmul %428, %411, %cst_139 {dimension_numbers = #tpu.dot_dimension_numbers<[1], [0], [0], [1], [0, 0, 1, 1], [], []>} : vector<8x16xf32>, vector<16x32xf32>, vector<8x32xf32> -> vector<8x32xf32>
    %430 = tpu.concatenate %279, %366 in 0 : vector<8x32xf32>, vector<8x32xf32> -> vector<16x32xf32>
    %431 = tpu.concatenate %300, %387 in 0 : vector<8x32xf32>, vector<8x32xf32> -> vector<16x32xf32>
    %432 = tpu.concatenate %321, %408 in 0 : vector<8x32xf32>, vector<8x32xf32> -> vector<16x32xf32>
    %433 = tpu.concatenate %342, %429 in 0 : vector<8x32xf32>, vector<8x32xf32> -> vector<16x32xf32>
    %434 = tpu.concatenate %430, %431, %432, %433 in 1 : vector<16x32xf32>, vector<16x32xf32>, vector<16x32xf32>, vector<16x32xf32> -> vector<16x128xf32>
    %c1_140 = arith.constant 1 : index
    %c0_141 = arith.constant 0 : index
    %c0_142 = arith.constant 0 : index
    %435 = vector.load %arg5[%c1_140, %c0_141, %c0_142] : memref<2x128x128xf32, #tpu.memory_space<vmem>>, vector<1x128x128xf32>
    %436 = vector.shape_cast %435 : vector<1x128x128xf32> to vector<128x128xf32>
    %cst_143 = arith.constant dense<0.000000e+00> : vector<16x128xf32>
    %437 = tpu.matmul %434, %436, %cst_143 {dimension_numbers = #tpu.dot_dimension_numbers<[1], [0], [0], [1], [0, 0, 1, 1], [], []>} : vector<16x128xf32>, vector<128x128xf32>, vector<16x128xf32> -> vector<16x128xf32>
    %c1_144 = arith.constant 1 : index
    %c0_145 = arith.constant 0 : index
    %c0_146 = arith.constant 0 : index
    %438 = vector.load %arg6[%c1_144, %c0_145, %c0_146] : memref<2x1x128xf32, #tpu.memory_space<vmem>>, vector<1x1x128xf32>
    %439 = vector.shape_cast %438 : vector<1x1x128xf32> to vector<1x128xf32>
    %440 = vector.broadcast %439 : vector<1x128xf32> to vector<16x128xf32>
    %441 = arith.addf %437, %440 : vector<16x128xf32>
    %cst_147 = arith.constant 0.000000e+00 : f32
    %442 = vector.broadcast %cst_147 : f32 to vector<16x128xf32>
    %443 = arith.maximumf %441, %442 : vector<16x128xf32>
    %c1_148 = arith.constant 1 : index
    %c0_149 = arith.constant 0 : index
    %c0_150 = arith.constant 0 : index
    %444 = vector.load %arg7[%c1_148, %c0_149, %c0_150] : memref<2x128x33xf32, #tpu.memory_space<vmem>>, vector<1x128x33xf32>
    %445 = vector.shape_cast %444 : vector<1x128x33xf32> to vector<128x33xf32>
    %cst_151 = arith.constant dense<0.000000e+00> : vector<16x33xf32>
    %446 = tpu.matmul %443, %445, %cst_151 {dimension_numbers = #tpu.dot_dimension_numbers<[1], [0], [0], [1], [0, 0, 1, 1], [], []>} : vector<16x128xf32>, vector<128x33xf32>, vector<16x33xf32> -> vector<16x33xf32>
    %c1_152 = arith.constant 1 : index
    %c0_153 = arith.constant 0 : index
    %c0_154 = arith.constant 0 : index
    %447 = vector.load %arg8[%c1_152, %c0_153, %c0_154] : memref<2x1x33xf32, #tpu.memory_space<vmem>>, vector<1x1x33xf32>
    %448 = vector.shape_cast %447 : vector<1x1x33xf32> to vector<1x33xf32>
    %449 = vector.broadcast %448 : vector<1x33xf32> to vector<16x33xf32>
    %450 = arith.addf %446, %449 : vector<16x33xf32>
    %451 = vector.extract_strided_slice %450 {offsets = [0, 32], sizes = [16, 1], strides = [1, 1]} : vector<16x33xf32> to vector<16x1xf32>
    %452 = arith.negf %451 : vector<16x1xf32>
    %453 = math.exp %452 : vector<16x1xf32>
    %cst_155 = arith.constant 1.000000e+00 : f32
    %454 = vector.broadcast %cst_155 : f32 to vector<16x1xf32>
    %455 = arith.addf %454, %453 : vector<16x1xf32>
    %456 = arith.divf %454, %455 : vector<16x1xf32>
    %457 = vector.broadcast %27 : f32 to vector<16x1xf32>
    %458 = arith.mulf %456, %457 : vector<16x1xf32>
    %459 = vector.extract_strided_slice %450 {offsets = [0, 0], sizes = [16, 32], strides = [1, 1]} : vector<16x33xf32> to vector<16x32xf32>
    %460 = vector.broadcast %458 : vector<16x1xf32> to vector<16x32xf32>
    %461 = arith.mulf %459, %460 : vector<16x32xf32>
    %462 = vector.extract_strided_slice %0 {offsets = [8, 0], sizes = [8, 32], strides = [1, 1]} : vector<32x32xf32> to vector<8x32xf32>
    %463 = vector.extract_strided_slice %461 {offsets = [0, 0], sizes = [8, 32], strides = [1, 1]} : vector<16x32xf32> to vector<8x32xf32>
    %464 = arith.addf %462, %463 : vector<8x32xf32>
    %c8 = arith.constant 8 : index
    %c0_156 = arith.constant 0 : index
    %465 = vector.load %arg9[%c8, %c0_156] : memref<32x32xf32, #tpu.memory_space<vmem>>, vector<8x32xf32>
    tpu.vector_store %arg9[%c8, %c0_156], %464 {strides = array<i32>} : memref<32x32xf32, #tpu.memory_space<vmem>>, vector<8x32xf32>,
    %466 = vector.extract_strided_slice %0 {offsets = [24, 0], sizes = [8, 32], strides = [1, 1]} : vector<32x32xf32> to vector<8x32xf32>
    %467 = vector.extract_strided_slice %461 {offsets = [8, 0], sizes = [8, 32], strides = [1, 1]} : vector<16x32xf32> to vector<8x32xf32>
    %468 = arith.addf %466, %467 : vector<8x32xf32>
    %c24 = arith.constant 24 : index
    %c0_157 = arith.constant 0 : index
    %469 = vector.load %arg9[%c24, %c0_157] : memref<32x32xf32, #tpu.memory_space<vmem>>, vector<8x32xf32>
    tpu.vector_store %arg9[%c24, %c0_157], %468 {strides = array<i32>} : memref<32x32xf32, #tpu.memory_space<vmem>>, vector<8x32xf32>,
    return
  }
}

</mosaic_0001>

<bundles_post_ra>
// kernel: tpu_custom_call.1
= control target key start
LH: loop header
LB: loop body
LE: loop exit
PB: predicated region body
PF: predicated region fallthrough
CT: control target
= control target key end

     0   :  { %15 = vsyncpa [#allocation4], 0  ;;  %s5985_s0 = inlined_call_operand.<no memory space> [shape: f32[1], index: 0, kind: input, shape index: {}]   ;;  %s5986_s1 = inlined_call_operand.vmem [shape: f32[32,32], index: 1, kind: input, shape index: {}]   ;;  %s5987_s2 = inlined_call_operand.vmem [shape: f32[2,1,32], index: 2, kind: input, shape index: {}]   ;;  %s5988_s3 = inlined_call_operand.hbm [shape: f32[2,32,384], index: 3, kind: input, shape index: {}]   ;;  %s5989_s4 = inlined_call_operand.vmem [shape: f32[2,1,384], index: 4, kind: input, shape index: {}]   ;;  %s5990_s5 = inlined_call_operand.vmem [shape: f32[2,128,128], index: 5, kind: input, shape index: {}]   ;;  %s5991_s6 = inlined_call_operand.vmem [shape: f32[2,1,128], index: 6, kind: input, shape index: {}]   ;;  %s5992_s7 = inlined_call_operand.vmem [shape: f32[2,128,33], index: 7, kind: input, shape index: {}]   ;;  %s5993_s8 = inlined_call_operand.vmem [shape: f32[2,1,33], index: 8, kind: input, shape index: {}]   ;;  %s5994_s9 = inlined_call_operand.hbm [shape: f32[32,32], index: 9, kind: output, shape index: {}]  }
   0x1   :  { %16 = vsyncpa [#allocation5], 0  ;;  %s5154_s30 = smov [#allocation3]   ;;  %s5106_s13 = scalar_lea.hbm %s5988_s3, 3072 }
   0x2   :  { %s28_s10 = sshll.u32 %s5154_s30, 4  ;;  %p5107_p0 = scmp.ne.s32.totalorder %s5988_s3, %s5106_s13  ;;  %s29_s10 = int_to_ptr.vmem [resolvable:$true] %s28_s10 }
   0x3   :  { %p5110_p1 = scmp.lt.u32.totalorder %s5106_s13, %s5988_s3 }
   0x5   :  { %p5112_p2 = pnand %p5110_p1, %p5107_p0 }
   0x7   :  { %5115 = shalt.err (!%p5112_p2)
}
   0x8   :  { %s5116_s18 = scalar_lea.vmem %s29_s10, 3072  ;;  %p5121_p4 = scmp.lt.s32.totalorder %s29_s10, %s29_s10 }
   0x9   :  { %p5117_p3 = scmp.ne.s32.totalorder %s29_s10, %s5116_s18  ;;  %p5122_p5 = scmp.lt.s32.totalorder %s5116_s18, %s5116_s18 }
   0xb   :  { %p5123_p6 = por %p5122_p5, %p5121_p4 }
   0xd   :  { %p5124_p7 = pnand %p5123_p6, %p5117_p3 }
   0xf   :  { %5127 = shalt.err (!%p5124_p7)
}
  0x10   :  { %s5155_s19 = smov 384   ;;  %s5156_s20 = smov 24  }
  0x11   :  { %34 = dma.hbm_to_vmem [thread:$0]  %s5988_s3, 3072, %s29_s10, [#allocation4], %s5155_s19, %s5155_s19, %s5156_s20  }
  0x12   :  { %5150 = dma.done.wait [#allocation4], 3072  }
  0x13   :  { %5151 = vsyncadd [#allocation4], 4294964224  ;;  %vm52_vm0 = vcmask 261120   ;;  %v48_v0 = vld [vmem:[%s5986_s1] sm:$0xff]  ;;  %v49_v1 = vld [vmem:[%s5986_s1 + $0x8] sm:$0xff]  ;;  %v5157_v25 = vmov 0.0  }
  0x14   :  { %v53_v2 = vsel %vm52_vm0, %v48_v0, 0.0  ;;  %v56_v3 = vsel %vm52_vm0, %v49_v1, 0.0  ;;  %v50_v4 = vld [vmem:[%s5986_s1 + $0x10] sm:$0xff]  ;;  %v51_v15 = vld [vmem:[%s5986_s1 + $0x18] sm:$0xff]  ;;  %v131_v18 = vld [vmem:[#allocation3 + $0x8] sm:$0xff]  ;;  %235 = vmatprep.mubr.f32.mxu0 %v5157_v25  ;;  %vm5159_vm1 = vmmov 0  }
  0x15   :  { %54 = vadd.xlane.f32.xlu0 %v53_v2  ;;  %v59_v5 = vsel %vm52_vm0, %v50_v4, 0.0  ;;  %v62_v17 = vsel %vm52_vm0, %v51_v15, 0.0  ;;  %v134_v19 = vld [vmem:[#allocation3 + $0x20] sm:$0xff]  ;;  %v133_v22 = vld [vmem:[#allocation3 + $0x18] sm:$0xff]  ;;  %v140_v24 = vld [vmem:[#allocation3 + $0x50] sm:$0xff]  ;;  %s5160_s14 = smov 96  }
  0x16   :  { %v130_v20 = vld [vmem:[#allocation3] sm:$0xff]  ;;  %v4577_v21 = vpack.c.bf16 %v134_v19, %v131_v18  ;;  %v137_v23 = vld [vmem:[#allocation3 + $0x38] sm:$0xff]  ;;  %v132_v28 = vld [vmem:[#allocation3 + $0x10] sm:$0xff]  ;;  %s5161_s15 = smov 64   ;;  %vm423_vm3 = vcmask 130048   ;;  %s5162_s16 = smov 32  }
  0x17   :  { %v4579_v26 = vpack.c.bf16 %v133_v22, %v130_v20  ;;  %v4581_v27 = vpack.c.bf16 %v140_v24, %v137_v23  ;;  %v135_v29 = vld [vmem:[#allocation3 + $0x28] sm:$0xff]  ;;  %v136_v30 = vld [vmem:[#allocation3 + $0x30] sm:$0xff]  ;;  %v138_v34 = vld [vmem:[#allocation3 + $0x40] sm:$0xff]  ;;  %vm1764_vm4 = vcmask 523264   ;;  %vm1767_vm5 = vcmask 785408  }
  0x18   :  { %4578 = vmatprep.subr.bf16.mxu0 %v4577_v21  ;;  %v4585_v31 = vpack.c.bf16 %v135_v29, %v132_v28  ;;  %v139_v32 = vld [vmem:[#allocation3 + $0x48] sm:$0xff]  ;;  %v141_v35 = vld [vmem:[#allocation3 + $0x58] sm:$0xff]  ;;  %v3875_v53 = vld [vmem:[%s5987_s2] ss:$0 sm:$0xff] }
  0x19   :  { %57 = vadd.xlane.f32.xlu0 %v56_v3  ;;  %4580 = vmatpush1.bf16.msra.mxu0 %v4579_v26  ;;  %v4583_v33 = vpack.c.bf16 %v139_v32, %v136_v30  ;;  %v4589_v36 = vpack.c.bf16 %v141_v35, %v138_v34  ;;  %v3877_v56 = vld [vmem:[%s5987_s2 + $0x1] ss:$0 sm:$0xff]  ;;  %vm5314_vm2 = vmpackc.low %vm52_vm0, %vm52_vm0 }
  0x1a   :  { %4582 = vmatprep.subr.bf16.mxu0 %v4581_v27  ;;  %4586 = vmatprep.subr.bf16.mxu1 %v4585_v31 }
  0x1b   :  { %4588 = vmatpush3.bf16.msra.mxu1 %v4585_v31 }
  0x1c   :  { %4590 = vmatprep.subr.bf16.mxu1 %v4589_v36 }
  0x1d   :  { %60 = vadd.xlane.f32.xlu0 %v59_v5  ;;  %4584 = vmatpush1.bf16.msra.mxu0 %v4583_v33 }
  0x1f   :  { %4592 = vmatpush3.bf16.msra.mxu1 %v4589_v36 }
  0xa2   :  { %v55_v6 = vpop.xlane.xlu0 %54 }
  0xa3   :  { %v66_v7 = vmul.f32 0.03125, %v55_v6  ;;  %v5158_v6 = vmov 0.0|0.0  }
  0xa4   :  { %4593 = vmatprep.subr.bf16.mxu1 %v5158_v6  ;;  %4600 = vmatprep.subr.bf16.mxu0 %v5158_v6 }
  0xa5   :  { %v70_v8 = vsub.f32 %v48_v0, %v66_v7 }
  0xa6   :  { %v58_v9 = vpop.xlane.xlu0 %57 }
  0xa7   :  { %v67_v10 = vmul.f32 0.03125, %v58_v9  ;;  %v74_v11 = vmul.f32 %v70_v8, %v70_v8 }
  0xa9   :  { %v5241_v12 = vsub.f32 %v49_v1, %v67_v10  ;;  %v78_v13 = vsel %vm52_vm0, %v74_v11, 0.0 }
  0xaa   :  { %79 = vadd.xlane.f32.xlu1 %v78_v13  ;;  %v61_v37 = vpop.xlane.xlu0 %60 }
  0xab   :  { %v75_v14 = vmul.f32 %v5241_v12, %v5241_v12  ;;  %v68_v38 = vmul.f32 0.03125, %v61_v37 }
  0xad   :  { %v81_v16 = vsel %vm52_vm0, %v75_v14, 0.0  ;;  %v72_v39 = vsub.f32 %v50_v4, %v68_v38  ;;  %v144_v14 = vlaneseq }
  0xae   :  { %82 = vadd.xlane.f32.xlu1 %v81_v16 }
  0xaf   :  { %v76_v40 = vmul.f32 %v72_v39, %v72_v39 }
  0xb1   :  { %v84_v41 = vsel %vm52_vm0, %v76_v40, 0.0 }
  0xb2   :  { %63 = vadd.xlane.f32.xlu1 %v62_v17  ;;  %85 = vadd.xlane.f32.xlu0 %v84_v41  ;;  %v142_v17 = vld [vmem:[%s5989_s4] sm:$0x7] }
 0x137   :  { %v80_v42 = vpop.xlane.xlu1 %79 }
 0x138   :  { %v90_v43 = vmul.f32 0.03125, %v80_v42 }
 0x13a   :  { %v94_v44 = vadd.f32 1e-05, %v90_v43 }
 0x13b   :  { %v83_v45 = vpop.xlane.xlu1 %82 }
 0x13c   :  { %5014 = vrsqrt.f32 %v94_v44  ;;  %v91_v46 = vmul.f32 0.03125, %v83_v45 }
 0x13e   :  { %v95_v47 = vadd.f32 1e-05, %v91_v46 }
 0x13f   :  { %v64_v48 = vpop.xlane.xlu1 %63  ;;  %v86_v63 = vpop.xlane.xlu0 %85 }
 0x140   :  { %5016 = vrsqrt.f32 %v95_v47  ;;  %v69_v49 = vmul.f32 0.03125, %v64_v48  ;;  %v92_v0 = vmul.f32 0.03125, %v86_v63 }
 0x142   :  { %v73_v50 = vsub.f32 %v51_v15, %v69_v49  ;;  %v96_v1 = vadd.f32 1e-05, %v92_v0  ;;  %v5294_v15 = vshrl.u32 %v144_v14, 7 }
 0x144   :  { %v77_v51 = vmul.f32 %v73_v50, %v73_v50  ;;  %5018 = vrsqrt.f32 %v96_v1  ;;  %v146_v16 = vsub.s32 0, %v5294_v15  ;;  %v154_v19 = vsub.s32 2, %v5294_v15 }
 0x145   :  { %v150_v20 = vsub.s32 1, %v5294_v15 }
 0x146   :  { %v5015_v52 = vpop.eup %5014  ;;  %v87_v54 = vsel %vm52_vm0, %v77_v51, 0.0  ;;  %v147_v18 = vrot.slane %v142_v17, %v146_v16  ;;  %v155_v22 = vrot.slane %v142_v17, %v154_v19 }
 0x147   :  { %v102_v55 = vmul.f32 %v5015_v52, %v70_v8  ;;  %88 = vadd.xlane.f32.xlu1 %v87_v54  ;;  %v151_v26 = vrot.slane %v142_v17, %v150_v20 }
 0x149   :  { %v113_v57 = vmul.f32 %v3875_v53, %v102_v55 }
 0x14a   :  { %v5017_v58 = vpop.eup %5016 }
 0x14b   :  { %v5260_v59 = vadd.f32 %v3877_v56, %v113_v57  ;;  %v103_v60 = vmul.f32 %v5017_v58, %v5241_v12 }
 0x14d   :  { %3878 = vmatmul.mubr.msk.f32.vlgmr.msra.gmra.mrb[0].mxu0 %vm52_vm0, %v5260_v59  ;;  %4193 = vmatprep.mubr.msk.f32.mxu1 %vm52_vm0, %v5260_v59  ;;  %v114_v61 = vmul.f32 %v3875_v53, %v103_v60 }
 0x14e   :  { %241 = vmatprep.mubr.f32.mxu0 %v5157_v25  ;;  %v5019_v2 = vpop.eup %5018 }
 0x14f   :  { %v5268_v62 = vadd.f32 %v3877_v56, %v114_v61  ;;  %v104_v3 = vmul.f32 %v5019_v2, %v72_v39 }
 0x151   :  { %3879 = vmatmul.mubr.msk.f32.gmra.mrb[2].mxu0 %vm52_vm0, %v5268_v62  ;;  %4194 = vmatmul.mubr.msk.f32.vlgmr.msra.gmra.mrb[0].mxu1 %vm52_vm0, %v5268_v62  ;;  %v115_v4 = vmul.f32 %v3875_v53, %v104_v3 }
 0x152   :  { %246 = vmatprep.mubr.f32.mxu0 %v5157_v25 }
 0x153   :  { %v5275_v5 = vadd.f32 %v3877_v56, %v115_v4 }
 0x155   :  { %3880 = vmatmul.mubr.msk.f32.gmra.mrb[4].mxu0 %vm52_vm0, %v5275_v5  ;;  %4196 = vmatprep.mubr.msk.f32.mxu1 %vm52_vm0, %v5275_v5 }
 0x156   :  { %252 = vmatprep.mubr.f32.mxu0 %v5157_v25 }
 0x1d4   :  { %v89_v7 = vpop.xlane.xlu1 %88 }
 0x1d5   :  { %v93_v8 = vmul.f32 0.03125, %v89_v7 }
 0x1d7   :  { %v97_v9 = vadd.f32 1e-05, %v93_v8 }
 0x1d9   :  { %5020 = vrsqrt.f32 %v97_v9 }
 0x1e3   :  { %v5021_v10 = vpop.eup %5020 }
 0x1e4   :  { %v105_v11 = vmul.f32 %v5021_v10, %v73_v50 }
 0x1e6   :  { %v116_v12 = vmul.f32 %v3875_v53, %v105_v11 }
 0x1e8   :  { %v5284_v13 = vadd.f32 %v3877_v56, %v116_v12 }
 0x1ea   :  { %3881 = vmatmul.mubr.msk.f32.gmra.mrb[6].mxu0 %vm52_vm0, %v5284_v13  ;;  %4197 = vmatmul.mubr.msk.f32.gmra.mrb[2].mxu1 %vm52_vm0, %v5284_v13 }
 0x1eb   :  { %4203 = vmatprep.mubr.msk.f32.mxu1 %vm5159_vm1, %v5157_v25  ;;  %4217 = vmatprep.mubr.msk.f32.mxu0 %vm5159_vm1, %v5157_v25 }
 0x220   :  { %v237_v21 = vpop.f32.mrb[0].mxu0 }
 0x221   :  { %v5306_v23 = vadd.f32 %v237_v21, %v147_v18  ;;  %v239_v24 = vpop.f32.mrb[1].mxu0 }
 0x222   :  { %v240_v32 = vadd.f32 %v239_v24, %v151_v26 }
 0x223   :  { %511 = vrot.lane.b32.xlu1 %v5306_v23, %s5160_s14 }
 0x224   :  { %v243_v27 = vpop.f32.mrb[2].mxu0  ;;  %v4195_v28 = vpop.f32.mrb[0].mxu1 }
 0x225   :  { %v330_v29 = vadd.f32 %v4195_v28, %v155_v22  ;;  %v244_v30 = vpop.f32.mrb[3].mxu0  ;;  %v324_v31 = vpop.f32.mrb[1].mxu1 }
 0x226   :  { %v245_v33 = vadd.f32 %v244_v30, %v151_v26  ;;  %v325_v34 = vadd.f32 %v324_v31, %v155_v22 }
 0x228   :  { %v4594_v36 = vpack.c.bf16 %v245_v33, %v240_v32  ;;  %v5318_v37 = vpack.i.bf16 %v245_v33, %v240_v32  ;;  %v4598_v38 = vpack.c.bf16 %v330_v29, %v325_v34  ;;  %v5320_v39 = vpack.i.bf16 %v330_v29, %v325_v34  ;;  %v248_v40 = vpop.f32.mrb[4].mxu0 }
 0x229   :  { %v5336_v41 = vadd.f32 %v248_v40, %v147_v18  ;;  %v250_v42 = vpop.f32.mrb[5].mxu0 }
 0x22a   :  { %4596 = vmatpush3.bf16.xpose.msk.msra.mxu1 %vm5314_vm2, %v4594_v36  ;;  %4868 = vrot.lane.b32.xlu1 %v5318_v37, %s5161_s15  ;;  %v5350_v53 = vadd.f32 %v250_v42, %v151_v26 }
 0x22b   :  { %4863 = vrot.lane.b32.xlu0 %v5318_v37, %s5160_s14  ;;  %4597 = vmatprep.subr.bf16.mxu1 %v5158_v6 }
 0x22e   :  { %689 = vrot.lane.b32.xlu1 %v5306_v23, %s5161_s15 }
 0x231   :  { %4204 = vmatmul.mubr.msk.f32.vlgmr.msra.gmra.mrb[4].mxu1 %vm52_vm0, %v5306_v23 }
 0x232   :  { %4599 = vmatpush3.bf16.msra.mxu1 %v4598_v38  ;;  %4210 = vmatprep.mubr.msk.f32.mxu1 %vm5159_vm1, %v5157_v25 }
 0x233   :  { %4604 = vmatprep.subr.bf16.mxu1 %v5158_v6 }
 0x295   :  { %v512_v43 = vpop.permute.xlu1 %511 }
 0x29c   :  { %v4869_v48 = vpop.permute.xlu1 %4868 }
 0x29d   :  { %v4864_v44 = vpop.permute.xlu0 %4863  ;;  %v4871_v49 = vunpack.i.h.bf16 %v4869_v48  ;;  %v4870_v50 = vunpack.i.l.bf16 %v4869_v48 }
 0x29e   :  { %v4866_v45 = vunpack.i.h.bf16 %v4864_v44  ;;  %v4865_v46 = vunpack.i.l.bf16 %v4864_v44 }
 0x29f   :  { %v4608_v51 = vpack.c.bf16 %v4871_v49, %v4870_v50 }
 0x2a0   :  { %v4601_v47 = vpack.c.bf16 %v4866_v45, %v4865_v46  ;;  %v690_v52 = vpop.permute.xlu1 %689 }
 0x2a2   :  { %4603 = vmatpush3.bf16.xpose.msk.msra.mxu0 %vm5314_vm2, %v4601_v47 }
 0x2a3   :  { %4607 = vmatprep.subr.bf16.mxu0 %v5158_v6 }
 0x2a9   :  { %4218 = vmatmul.mubr.msk.f32.vlgmr.msra.gmra.mrb[8].mxu0 %vm52_vm0, %v512_v43 }
 0x2aa   :  { %4610 = vmatpush3.bf16.xpose.msk.msra.mxu0 %vm5314_vm2, %v4608_v51  ;;  %4231 = vmatprep.mubr.msk.f32.mxu0 %vm5159_vm1, %v5157_v25 }
 0x2ab   :  { %4618 = vmatprep.subr.bf16.mxu0 %v5158_v6 }
 0x2b1   :  { %4232 = vmatmul.mubr.msk.f32.vlgmr.msra.gmra.mrb[10].mxu0 %vm52_vm0, %v690_v52 }
 0x2b2   :  { %4252 = vmatprep.mubr.msk.f32.mxu0 %vm5159_vm1, %v5157_v25 }
 0x2bd   :  { %v254_v54 = vpop.f32.mrb[6].mxu0  ;;  %v4198_v55 = vpop.f32.mrb[2].mxu1 }
 0x2be   :  { %v255_v56 = vpop.f32.mrb[7].mxu0  ;;  %v5352_v57 = vadd.f32 %v4198_v55, %v155_v22  ;;  %v334_v58 = vpop.f32.mrb[3].mxu1 }
 0x2bf   :  { %v5354_v60 = vadd.f32 %v255_v56, %v151_v26  ;;  %v5356_v61 = vadd.f32 %v334_v58, %v155_v22 }
 0x2c1   :  { %v4622_v63 = vpack.c.bf16 %v5354_v60, %v5350_v53  ;;  %v4626_v0 = vpack.c.bf16 %v5352_v57, %v5356_v61  ;;  %v5364_v1 = vpack.i.bf16 %v5354_v60, %v5350_v53  ;;  %v5368_v2 = vpack.i.bf16 %v5352_v57, %v5356_v61 }
 0x304   :  { %v418_v3 = vpop.f32.mrb[4].mxu1 }
 0x305   :  { %v422_v4 = vmul.f32 0.17677669, %v418_v3  ;;  %v4205_v7 = vpop.f32.mrb[5].mxu1 }
 0x307   :  { %v424_v8 = vsel %vm423_vm3, %v422_v4, -inf }
 0x308   :  { %425 = vmax.xlane.f32.xlu0 %v424_v8 }
 0x37c   :  { %v589_v9 = vpop.f32.mrb[8].mxu0 }
 0x37d   :  { %v593_v10 = vmul.f32 0.17677669, %v589_v9  ;;  %v4219_v11 = vpop.f32.mrb[9].mxu0 }
 0x37f   :  { %v594_v12 = vsel %vm423_vm3, %v593_v10, -inf }
 0x380   :  { %595 = vmax.xlane.f32.xlu1 %v594_v12 }
 0x384   :  { %v767_v14 = vpop.f32.mrb[10].mxu0 }
 0x385   :  { %v771_v17 = vmul.f32 0.17677669, %v767_v14  ;;  %v4233_v18 = vpop.f32.mrb[11].mxu0 }
 0x387   :  { %v772_v21 = vsel %vm423_vm3, %v771_v17, -inf }
 0x388   :  { %773 = vmax.xlane.f32.xlu0 %v772_v21 }
 0x391   :  { %4878 = vrot.lane.b32.xlu1 %v5320_v39, %s5161_s15 }
 0x395   :  { %v426_v22 = vpop.xlane.xlu0 %425 }
 0x396   :  { %v427_v24 = vsub.f32 %v422_v4, %v426_v22 }
 0x398   :  { %v428_v26 = vmul.f32 1.442695, %v427_v24 }
 0x39a   :  { %5022 = vpow2.f32 %v428_v26 }
 0x3a4   :  { %v5023_v27 = vpop.eup %5022 }
 0x3a5   :  { %v430_v28 = vsel %vm423_vm3, %v5023_v27, 0.0 }
 0x3a6   :  { %431 = vadd.xlane.f32.xlu0 %v430_v28 }
 0x40d   :  { %v596_v29 = vpop.xlane.xlu1 %595 }
 0x40e   :  { %v597_v30 = vsub.f32 %v593_v10, %v596_v29 }
 0x410   :  { %v598_v31 = vmul.f32 1.442695, %v597_v30 }
 0x411   :  { %v4879_v50 = vpop.permute.xlu1 %4878 }
 0x412   :  { %5024 = vpow2.f32 %v598_v31  ;;  %v4881_v3 = vunpack.i.h.bf16 %v4879_v50  ;;  %v4880_v4 = vunpack.i.l.bf16 %v4879_v50 }
 0x414   :  { %v4612_v10 = vpack.c.bf16 %v4881_v3, %v4880_v4 }
 0x415   :  { %v774_v32 = vpop.xlane.xlu0 %773 }
 0x416   :  { %v775_v33 = vsub.f32 %v771_v17, %v774_v32 }
 0x418   :  { %v776_v34 = vmul.f32 1.442695, %v775_v33 }
 0x41a   :  { %5026 = vpow2.f32 %v776_v34 }
 0x41c   :  { %v5025_v36 = vpop.eup %5024 }
 0x41d   :  { %v600_v38 = vsel %vm423_vm3, %v5025_v36, 0.0 }
 0x41e   :  { %601 = vadd.xlane.f32.xlu0 %v600_v38 }
 0x424   :  { %v5027_v40 = vpop.eup %5026 }
 0x425   :  { %v778_v42 = vsel %vm423_vm3, %v5027_v40, 0.0 }
 0x426   :  { %779 = vadd.xlane.f32.xlu1 %v778_v42 }
 0x433   :  { %v432_v43 = vpop.xlane.xlu0 %431 }
 0x434   :  { %4873 = vrot.lane.b32.xlu0 %v5320_v39, %s5160_s14  ;;  %5028 = vrcp.f32 %v432_v43 }
 0x437   :  { %4883 = vrot.lane.b32.xlu1 %v5318_v37, %s5162_s16 }
 0x43b   :  { %865 = vrot.lane.b32.xlu1 %v5306_v23, %s5162_s16 }
 0x43e   :  { %v5029_v44 = vpop.eup %5028 }
 0x43f   :  { %v434_v45 = vmul.f32 %v5029_v44, %v432_v43 }
 0x441   :  { %v435_v46 = vsub.f32 2.0, %v434_v45 }
 0x443   :  { %v436_v47 = vmul.f32 %v5029_v44, %v435_v46 }
 0x445   :  { %v437_v48 = vmul.f32 %v5023_v27, %v436_v47 }
 0x447   :  { %4211 = vmatmul.mubr.msk.f32.vlgmr.msra.gmra.mrb[6].mxu1 %vm423_vm3, %v437_v48 }
 0x448   :  { %4224 = vmatprep.mubr.msk.f32.mxu1 %vm5159_vm1, %v5157_v25 }
 0x4ab   :  { %v602_v49 = vpop.xlane.xlu0 %601 }
 0x4ac   :  { %5030 = vrcp.f32 %v602_v49 }
 0x4af   :  { %v4874_v51 = vpop.permute.xlu0 %4873 }
 0x4b0   :  { %v4876_v52 = vunpack.i.h.bf16 %v4874_v51  ;;  %v4875_v54 = vunpack.i.l.bf16 %v4874_v51 }
 0x4b2   :  { %v4605_v37 = vpack.c.bf16 %v4876_v52, %v4875_v54 }
 0x4b3   :  { %v780_v55 = vpop.xlane.xlu1 %779 }
 0x4b4   :  { %5032 = vrcp.f32 %v780_v55  ;;  %4606 = vmatpush3.bf16.msra.mxu1 %v4605_v37 }
 0x4b5   :  { %4611 = vmatprep.subr.bf16.mxu1 %v5158_v6 }
 0x4b6   :  { %v5031_v23 = vpop.eup %5030 }
 0x4b7   :  { %v604_v56 = vmul.f32 %v5031_v23, %v602_v49  ;;  %v4884_v12 = vpop.permute.xlu1 %4883 }
 0x4b8   :  { %v4886_v18 = vunpack.i.h.bf16 %v4884_v12  ;;  %v4885_v21 = vunpack.i.l.bf16 %v4884_v12 }
 0x4b9   :  { %v605_v58 = vsub.f32 2.0, %v604_v56 }
 0x4ba   :  { %v4615_v24 = vpack.c.bf16 %v4886_v18, %v4885_v21 }
 0x4bb   :  { %v606_v7 = vmul.f32 %v5031_v23, %v605_v58  ;;  %v866_v26 = vpop.permute.xlu1 %865 }
 0x4bd   :  { %v607_v8 = vmul.f32 %v5025_v36, %v606_v7 }
 0x4be   :  { %v5033_v9 = vpop.eup %5032 }
 0x4bf   :  { %v782_v11 = vmul.f32 %v5033_v9, %v780_v55  ;;  %4225 = vmatmul.mubr.msk.f32.vlgmr.msra.gmra.mrb[8].mxu1 %vm423_vm3, %v607_v8 }
 0x4c0   :  { %4613 = vmatpush3.bf16.msra.mxu1 %v4612_v10  ;;  %4238 = vmatprep.mubr.msk.f32.mxu1 %vm5159_vm1, %v5157_v25 }
 0x4c1   :  { %v783_v14 = vsub.f32 2.0, %v782_v11  ;;  %4614 = vmatprep.subr.bf16.mxu1 %v5158_v6 }
 0x4c3   :  { %v784_v17 = vmul.f32 %v5033_v9, %v783_v14 }
 0x4c5   :  { %v785_v22 = vmul.f32 %v5027_v40, %v784_v17 }
 0x4c7   :  { %4239 = vmatmul.mubr.msk.f32.vlgmr.msra.gmra.mrb[10].mxu1 %vm423_vm3, %v785_v22 }
 0x4c8   :  { %4245 = vmatprep.mubr.msk.f32.mxu1 %vm5159_vm1, %v5157_v25 }
 0x4c9   :  { %4617 = vmatpush3.bf16.xpose.msk.msra.mxu1 %vm5314_vm2, %v4615_v24 }
 0x4ca   :  { %4625 = vmatprep.subr.bf16.mxu1 %v5158_v6 }
 0x4d0   :  { %4246 = vmatmul.mubr.msk.f32.vlgmr.msra.gmra.mrb[12].mxu1 %vm52_vm0, %v866_v26 }
 0x4d1   :  { %4627 = vmatpush3.bf16.msra.mxu1 %v4626_v0  ;;  %4266 = vmatprep.mubr.msk.f32.mxu1 %vm5159_vm1, %v5157_v25 }
 0x4d2   :  { %4628 = vmatprep.subr.bf16.mxu1 %v5158_v6 }
 0x51a   :  { %v5405_v27 = vpop.f32.mrb[6].mxu1 }
 0x51b   :  { %v4212_v28 = vpop.f32.mrb[7].mxu1 }
 0x592   :  { %v5407_v29 = vpop.f32.mrb[8].mxu1 }
 0x593   :  { %v4226_v30 = vpop.f32.mrb[9].mxu1 }
 0x59a   :  { %v5409_v31 = vpop.f32.mrb[10].mxu1 }
 0x59b   :  { %v4240_v32 = vpop.f32.mrb[11].mxu1 }
 0x5a3   :  { %v943_v33 = vpop.f32.mrb[12].mxu1 }
 0x5a4   :  { %v947_v34 = vmul.f32 0.17677669, %v943_v33  ;;  %v4247_v36 = vpop.f32.mrb[13].mxu1 }
 0x5a6   :  { %v948_v57 = vsel %vm423_vm3, %v947_v34, -inf }
 0x5a7   :  { %949 = vmax.xlane.f32.xlu0 %v948_v57 }
 0x5bd   :  { %4888 = vrot.lane.b32.xlu0 %v5320_v39, %s5162_s16 }
 0x5c1   :  { %1208 = vrot.lane.b32.xlu0 %v5336_v41, %s5160_s14 }
 0x634   :  { %v950_v61 = vpop.xlane.xlu0 %949 }
 0x635   :  { %v951_v0 = vsub.f32 %v947_v34, %v950_v61 }
 0x637   :  { %v952_v38 = vmul.f32 1.442695, %v951_v0 }
 0x638   :  { %v4889_v40 = vpop.permute.xlu0 %4888 }
 0x639   :  { %5034 = vpow2.f32 %v952_v38  ;;  %v4891_v42 = vunpack.i.h.bf16 %v4889_v40  ;;  %v4890_v43 = vunpack.i.l.bf16 %v4889_v40 }
 0x63b   :  { %v4619_v44 = vpack.c.bf16 %v4891_v42, %v4890_v43 }
 0x63c   :  { %v1209_v21 = vpop.permute.xlu0 %1208 }
 0x63d   :  { %4620 = vmatpush3.bf16.msra.mxu0 %v4619_v44 }
 0x63e   :  { %4621 = vmatprep.subr.bf16.mxu0 %v5158_v6 }
 0x643   :  { %v5035_v45 = vpop.eup %5034 }
 0x644   :  { %v954_v46 = vsel %vm423_vm3, %v5035_v45, 0.0 }
 0x645   :  { %955 = vadd.xlane.f32.xlu1 %v954_v46 }
 0x6d2   :  { %v956_v47 = vpop.xlane.xlu1 %955 }
 0x6d3   :  { %5036 = vrcp.f32 %v956_v47 }
 0x6dd   :  { %v5037_v39 = vpop.eup %5036 }
 0x6de   :  { %v958_v48 = vmul.f32 %v5037_v39, %v956_v47 }
 0x6e0   :  { %v959_v49 = vsub.f32 2.0, %v958_v48 }
 0x6e2   :  { %v960_v50 = vmul.f32 %v5037_v39, %v959_v49 }
 0x6e4   :  { %v961_v51 = vmul.f32 %v5035_v45, %v960_v50 }
 0x6e6   :  { %4253 = vmatmul.mubr.msk.f32.vlgmr.msra.gmra.mrb[12].mxu0 %vm423_vm3, %v961_v51 }
 0x6e7   :  { %4624 = vmatpush3.bf16.xpose.msk.msra.mxu0 %vm5314_vm2, %v4622_v63  ;;  %4259 = vmatprep.mubr.msk.f32.mxu0 %vm5159_vm1, %v5157_v25 }
 0x6e8   :  { %4632 = vmatprep.subr.bf16.mxu0 %v5158_v6 }
 0x6ee   :  { %4260 = vmatmul.mubr.msk.f32.vlgmr.msra.gmra.mrb[14].mxu0 %vm52_vm0, %v5336_v41 }
 0x6ef   :  { %4280 = vmatprep.mubr.msk.f32.mxu0 %vm5159_vm1, %v5157_v25 }
 0x7b9   :  { %v5431_v52 = vpop.f32.mrb[12].mxu0 }
 0x7ba   :  { %v4254_v54 = vpop.f32.mrb[13].mxu0 }
 0x7c1   :  { %v1116_v37 = vpop.f32.mrb[14].mxu0 }
 0x7c2   :  { %v1120_v55 = vmul.f32 0.17677669, %v1116_v37  ;;  %v4261_v53 = vpop.f32.mrb[15].mxu0 }
 0x7c4   :  { %v1121_v60 = vsel %vm423_vm3, %v1120_v55, -inf }
 0x7c5   :  { %1122 = vmax.xlane.f32.xlu1 %v1121_v60 }
 0x852   :  { %v1123_v63 = vpop.xlane.xlu1 %1122 }
 0x853   :  { %v1124_v23 = vsub.f32 %v1120_v55, %v1123_v63 }
 0x855   :  { %v1125_v56 = vmul.f32 1.442695, %v1124_v23 }
 0x857   :  { %5038 = vpow2.f32 %v1125_v56 }
 0x861   :  { %v5039_v58 = vpop.eup %5038 }
 0x862   :  { %v1127_v3 = vsel %vm423_vm3, %v5039_v58, 0.0 }
 0x863   :  { %1128 = vadd.xlane.f32.xlu1 %v1127_v3 }
 0x874   :  { %4893 = vrot.lane.b32.xlu1 %v5364_v1, %s5160_s14 }
 0x8f0   :  { %v1129_v4 = vpop.xlane.xlu1 %1128 }
 0x8f1   :  { %5040 = vrcp.f32 %v1129_v4 }
 0x8f4   :  { %v4894_v9 = vpop.permute.xlu1 %4893 }
 0x8f5   :  { %v4896_v11 = vunpack.i.h.bf16 %v4894_v9  ;;  %v4895_v12 = vunpack.i.l.bf16 %v4894_v9 }
 0x8f7   :  { %v4629_v18 = vpack.c.bf16 %v4896_v11, %v4895_v12 }
 0x8fb   :  { %v5041_v7 = vpop.eup %5040 }
 0x8fc   :  { %v1131_v8 = vmul.f32 %v5041_v7, %v1129_v4 }
 0x8fe   :  { %v1132_v10 = vsub.f32 2.0, %v1131_v8 }
 0x900   :  { %v1133_v14 = vmul.f32 %v5041_v7, %v1132_v10 }
 0x902   :  { %v1134_v17 = vmul.f32 %v5039_v58, %v1133_v14 }
 0x904   :  { %4267 = vmatmul.mubr.msk.f32.vlgmr.msra.gmra.mrb[14].mxu1 %vm423_vm3, %v1134_v17 }
 0x905   :  { %4631 = vmatpush3.bf16.xpose.msk.msra.mxu1 %vm5314_vm2, %v4629_v18  ;;  %4273 = vmatprep.mubr.msk.f32.mxu1 %vm5159_vm1, %v5157_v25 }
 0x906   :  { %4639 = vmatprep.subr.bf16.mxu1 %v5158_v6 }
 0x90c   :  { %4274 = vmatmul.mubr.msk.f32.vlgmr.msra.gmra.mrb[16].mxu1 %vm52_vm0, %v1209_v21 }
 0x90d   :  { %4294 = vmatprep.mubr.msk.f32.mxu1 %vm5159_vm1, %v5157_v25 }
 0x9d7   :  { %v5446_v22 = vpop.f32.mrb[14].mxu1 }
 0x9d8   :  { %v4268_v24 = vpop.f32.mrb[15].mxu1 }
 0x9df   :  { %v1286_v26 = vpop.f32.mrb[16].mxu1 }
 0x9e0   :  { %v1290_v28 = vmul.f32 0.17677669, %v1286_v26  ;;  %v4275_v30 = vpop.f32.mrb[17].mxu1 }
 0x9e2   :  { %v1291_v32 = vsel %vm423_vm3, %v1290_v28, -inf }
 0x9e3   :  { %1292 = vmax.xlane.f32.xlu0 %v1291_v32 }
 0x9f9   :  { %4898 = vrot.lane.b32.xlu0 %v5368_v2, %s5160_s14 }
 0x9fd   :  { %1386 = vrot.lane.b32.xlu0 %v5336_v41, %s5161_s15 }
 0xa70   :  { %v1293_v33 = vpop.xlane.xlu0 %1292 }
 0xa71   :  { %v1294_v34 = vsub.f32 %v1290_v28, %v1293_v33 }
 0xa73   :  { %v1295_v36 = vmul.f32 1.442695, %v1294_v34 }
 0xa74   :  { %v4899_v57 = vpop.permute.xlu0 %4898 }
 0xa75   :  { %5042 = vpow2.f32 %v1295_v36  ;;  %v4901_v61 = vunpack.i.h.bf16 %v4899_v57  ;;  %v4900_v0 = vunpack.i.l.bf16 %v4899_v57 }
 0xa77   :  { %v4633_v38 = vpack.c.bf16 %v4901_v61, %v4900_v0 }
 0xa78   :  { %v1387_v54 = vpop.permute.xlu0 %1386 }
 0xa79   :  { %4634 = vmatpush3.bf16.msra.mxu0 %v4633_v38 }
 0xa7a   :  { %4635 = vmatprep.subr.bf16.mxu0 %v5158_v6 }
 0xa7f   :  { %v5043_v40 = vpop.eup %5042 }
 0xa80   :  { %v1297_v42 = vsel %vm423_vm3, %v5043_v40, 0.0 }
 0xa81   :  { %1298 = vadd.xlane.f32.xlu1 %v1297_v42 }
 0xa92   :  { %4903 = vrot.lane.b32.xlu1 %v5364_v1, %s5161_s15 }
 0xb0e   :  { %v1299_v43 = vpop.xlane.xlu1 %1298 }
 0xb0f   :  { %5044 = vrcp.f32 %v1299_v43 }
 0xb12   :  { %v4904_v46 = vpop.permute.xlu1 %4903 }
 0xb13   :  { %v4906_v39 = vunpack.i.h.bf16 %v4904_v46  ;;  %v4905_v48 = vunpack.i.l.bf16 %v4904_v46 }
 0xb15   :  { %v4636_v51 = vpack.c.bf16 %v4906_v39, %v4905_v48 }
 0xb19   :  { %v5045_v44 = vpop.eup %5044 }
 0xb1a   :  { %v1301_v45 = vmul.f32 %v5045_v44, %v1299_v43 }
 0xb1c   :  { %v1302_v47 = vsub.f32 2.0, %v1301_v45 }
 0xb1e   :  { %v1303_v49 = vmul.f32 %v5045_v44, %v1302_v47 }
 0xb20   :  { %v1304_v50 = vmul.f32 %v5043_v40, %v1303_v49 }
 0xb22   :  { %4281 = vmatmul.mubr.msk.f32.vlgmr.msra.gmra.mrb[16].mxu0 %vm423_vm3, %v1304_v50 }
 0xb23   :  { %4638 = vmatpush3.bf16.xpose.msk.msra.mxu0 %vm5314_vm2, %v4636_v51  ;;  %4287 = vmatprep.mubr.msk.f32.mxu0 %vm5159_vm1, %v5157_v25 }
 0xb24   :  { %4646 = vmatprep.subr.bf16.mxu0 %v5158_v6 }
 0xb2a   :  { %4288 = vmatmul.mubr.msk.f32.vlgmr.msra.gmra.mrb[18].mxu0 %vm52_vm0, %v1387_v54 }
 0xb2b   :  { %4308 = vmatprep.mubr.msk.f32.mxu0 %vm5159_vm1, %v5157_v25 }
 0xbf5   :  { %v1382_v37 = vpop.f32.mrb[16].mxu0 }
 0xbf6   :  { %v4922_v55 = vpack.i.bf16 %v1382_v37, %v5407_v29  ;;  %v4282_v53 = vpop.f32.mrb[17].mxu0  ;;  %v1770_v37 = vld [vmem:[%s5990_s5] sm:$0xff] }
 0xbfd   :  { %v1464_v60 = vpop.f32.mrb[18].mxu0 }
 0xbfe   :  { %v1468_v63 = vmul.f32 0.17677669, %v1464_v60  ;;  %v4289_v23 = vpop.f32.mrb[19].mxu0  ;;  %v1773_v60 = vld [vmem:[%s5990_s5 + $0x18] sm:$0xff] }
 0xbff   :  { %v1774_v23 = vld [vmem:[%s5990_s5 + $0x20] sm:$0xff] }
 0xc00   :  { %v1469_v56 = vsel %vm423_vm3, %v1468_v63, -inf }
 0xc01   :  { %1470 = vmax.xlane.f32.xlu0 %v1469_v56  ;;  %v1775_v56 = vld [vmem:[%s5990_s5 + $0x28] sm:$0xff] }
 0xc17   :  { %4908 = vrot.lane.b32.xlu0 %v5368_v2, %s5161_s15 }
 0xc1b   :  { %1562 = vrot.lane.b32.xlu0 %v5336_v41, %s5162_s16 }
 0xc8e   :  { %v1471_v58 = vpop.xlane.xlu0 %1470 }
 0xc8f   :  { %v1472_v3 = vsub.f32 %v1468_v63, %v1471_v58  ;;  %v4657_v58 = vpack.c.bf16 %v1775_v56, %v1774_v23  ;;  %v2000_v23 = vld [vmem:[#allocation3 + $0x60] sm:$0xff]  ;;  %v2003_v56 = vld [vmem:[#allocation3 + $0x78] sm:$0xff] }
 0xc91   :  { %v1473_v4 = vmul.f32 1.442695, %v1472_v3  ;;  %v1776_v3 = vld [vmem:[%s5990_s5 + $0x30] sm:$0xff] }
 0xc92   :  { %v4909_v7 = vpop.permute.xlu0 %4908 }
 0xc93   :  { %5046 = vpow2.f32 %v1473_v4  ;;  %v4911_v8 = vunpack.i.h.bf16 %v4909_v7  ;;  %v4910_v29 = vunpack.i.l.bf16 %v4909_v7  ;;  %v1777_v4 = vld [vmem:[%s5990_s5 + $0x38] sm:$0xff] }
 0xc94   :  { %v4661_v7 = vpack.c.bf16 %v1777_v4, %v1776_v3  ;;  %v2007_v3 = vld [vmem:[#allocation3 + $0x98] sm:$0xff]  ;;  %v2010_v4 = vld [vmem:[#allocation3 + $0xb0] sm:$0xff] }
 0xc95   :  { %v4640_v9 = vpack.c.bf16 %v4911_v8, %v4910_v29  ;;  %v1778_v8 = vld [vmem:[%s5990_s5 + $0x40] sm:$0xff]  ;;  %v1779_v29 = vld [vmem:[%s5990_s5 + $0x48] sm:$0xff] }
 0xc97   :  { %4641 = vmatpush3.bf16.msra.mxu1 %v4640_v9  ;;  %v4665_v9 = vpack.c.bf16 %v1779_v29, %v1778_v8 }
 0xc98   :  { %4642 = vmatprep.subr.bf16.mxu1 %v5158_v6 }
 0xc9d   :  { %v5047_v10 = vpop.eup %5046 }
 0xc9e   :  { %v1475_v11 = vsel %vm423_vm3, %v5047_v10, 0.0 }
 0xc9f   :  { %1476 = vadd.xlane.f32.xlu1 %v1475_v11  ;;  %v1781_v11 = vld [vmem:[%s5990_s5 + $0x58] sm:$0xff] }
 0xcb0   :  { %4913 = vrot.lane.b32.xlu1 %v5364_v1, %s5162_s16  ;;  %v1563_v1 = vpop.permute.xlu0 %1562 }
 0xd2c   :  { %v1477_v12 = vpop.xlane.xlu1 %1476 }
 0xd2d   :  { %5048 = vrcp.f32 %v1477_v12 }
 0xd30   :  { %v4914_v17 = vpop.permute.xlu1 %4913 }
 0xd31   :  { %v4916_v21 = vunpack.i.h.bf16 %v4914_v17  ;;  %v4915_v24 = vunpack.i.l.bf16 %v4914_v17 }
 0xd33   :  { %v4643_v30 = vpack.c.bf16 %v4916_v21, %v4915_v24  ;;  %v1785_v21 = vld [vmem:[%s5990_s5 + $0x78] sm:$0xff] }
 0xd37   :  { %v5049_v41 = vpop.eup %5048 }
 0xd38   :  { %v1479_v14 = vmul.f32 %v5049_v41, %v1477_v12 }
 0xd3a   :  { %v1480_v18 = vsub.f32 2.0, %v1479_v14  ;;  %v1783_v14 = vld [vmem:[%s5990_s5 + $0x68] sm:$0xff] }
 0xd3c   :  { %v1481_v26 = vmul.f32 %v5049_v41, %v1480_v18  ;;  %v1782_v41 = vld [vmem:[%s5990_s5 + $0x60] sm:$0xff]  ;;  %v1784_v18 = vld [vmem:[%s5990_s5 + $0x70] sm:$0xff] }
 0xd3d   :  { %v4673_v17 = vpack.c.bf16 %v1783_v14, %v1782_v41  ;;  %v4677_v24 = vpack.c.bf16 %v1785_v21, %v1784_v18  ;;  %v2006_v18 = vld [vmem:[#allocation3 + $0x90] sm:$0xff]  ;;  %v2009_v21 = vld [vmem:[#allocation3 + $0xa8] sm:$0xff] }
 0xd3e   :  { %v1482_v28 = vmul.f32 %v5047_v10, %v1481_v26  ;;  %v1780_v10 = vld [vmem:[%s5990_s5 + $0x50] sm:$0xff]  ;;  %v2001_v26 = vld [vmem:[#allocation3 + $0x68] sm:$0xff] }
 0xd3f   :  { %v4669_v12 = vpack.c.bf16 %v1781_v11, %v1780_v10 }
 0xd40   :  { %4295 = vmatmul.mubr.msk.f32.vlgmr.msra.gmra.mrb[18].mxu1 %vm423_vm3, %v1482_v28  ;;  %v2004_v28 = vld [vmem:[#allocation3 + $0x80] sm:$0xff] }
 0xd41   :  { %4645 = vmatpush3.bf16.xpose.msk.msra.mxu1 %vm5314_vm2, %v4643_v30  ;;  %4301 = vmatprep.mubr.msk.f32.mxu1 %vm5159_vm1, %v5157_v25  ;;  %v4713_v30 = vpack.c.bf16 %v2004_v28, %v2001_v26  ;;  %v2002_v28 = vld [vmem:[#allocation3 + $0x70] sm:$0xff] }
 0xd48   :  { %4302 = vmatmul.mubr.msk.f32.vlgmr.msra.gmra.mrb[20].mxu1 %vm52_vm0, %v1563_v1 }
 0xe13   :  { %v1558_v32 = vpop.f32.mrb[18].mxu1 }
 0xe14   :  { %v4927_v33 = vpack.i.bf16 %v1558_v32, %v5409_v31  ;;  %v4296_v34 = vpop.f32.mrb[19].mxu1 }
 0xe15   :  { %v1870_v34 = vld [vmem:[%s5992_s7] sm:$0xff] }
 0xe1b   :  { %v1640_v36 = vpop.f32.mrb[20].mxu1 }
 0xe1c   :  { %v1644_v57 = vmul.f32 0.17677669, %v1640_v36  ;;  %v4303_v61 = vpop.f32.mrb[21].mxu1  ;;  %v1871_v36 = vld [vmem:[%s5992_s7 + $0x8] sm:$0xff] }
 0xe1d   :  { %v4681_v61 = vpack.c.bf16 %v1871_v36, %v1870_v34 }
 0xe1e   :  { %v1645_v0 = vsel %vm423_vm3, %v1644_v57, -inf }
 0xe1f   :  { %1646 = vmax.xlane.f32.xlu1 %v1645_v0  ;;  %4682 = vmatprep.subr.bf16.mxu1 %v4681_v61 }
 0xe20   :  { %4684 = vmatpush3.bf16.msra.mxu1 %v4681_v61  ;;  %v2008_v61 = vld [vmem:[#allocation3 + $0xa0] sm:$0xff] }
 0xe30   :  { %4923 = vrot.lane.b32.xlu1 %v4922_v55, %s5162_s16  ;;  %v1772_v55 = vld [vmem:[%s5990_s5 + $0x10] sm:$0xff] }
 0xe31   :  { %v4653_v63 = vpack.c.bf16 %v1773_v60, %v1772_v55 }
 0xe34   :  { %4928 = vrot.lane.b32.xlu1 %v4927_v33, %s5161_s15 }
 0xeac   :  { %v1647_v38 = vpop.xlane.xlu1 %1646 }
 0xead   :  { %v1648_v40 = vsub.f32 %v1644_v57, %v1647_v38  ;;  %v1872_v57 = vld [vmem:[%s5992_s7 + $0x10] sm:$0xff]  ;;  %v1874_v38 = vld [vmem:[%s5992_s7 + $0x20] sm:$0xff] }
 0xeaf   :  { %v1649_v42 = vmul.f32 1.442695, %v1648_v40  ;;  %v1875_v40 = vld [vmem:[%s5992_s7 + $0x28] sm:$0xff] }
 0xeb1   :  { %5050 = vpow2.f32 %v1649_v42  ;;  %v4689_v42 = vpack.c.bf16 %v1875_v40, %v1874_v38 }
 0xebb   :  { %v5051_v43 = vpop.eup %5050 }
 0xebc   :  { %v1651_v44 = vsel %vm423_vm3, %v5051_v43, 0.0 }
 0xebd   :  { %1652 = vadd.xlane.f32.xlu0 %v1651_v44  ;;  %v1877_v44 = vld [vmem:[%s5992_s7 + $0x38] sm:$0xff] }
 0xed3   :  { %4918 = vrot.lane.b32.xlu0 %v5368_v2, %s5162_s16  ;;  %v1771_v2 = vld [vmem:[%s5990_s5 + $0x8] sm:$0xff] }
 0xed4   :  { %v4649_v53 = vpack.c.bf16 %v1771_v2, %v1770_v37  ;;  %v4924_v37 = vpop.permute.xlu1 %4923 }
 0xed5   :  { %v4926_v55 = vunpack.i.h.bf16 %v4924_v37 }
 0xed8   :  { %v4929_v2 = vpop.permute.xlu1 %4928 }
 0xed9   :  { %v4931_v60 = vunpack.i.h.bf16 %v4929_v2 }
 0xf4a   :  { %v1653_v31 = vpop.xlane.xlu0 %1652 }
 0xf4b   :  { %5052 = vrcp.f32 %v1653_v31 }
 0xf4e   :  { %v4919_v45 = vpop.permute.xlu0 %4918 }
 0xf4f   :  { %v4921_v46 = vunpack.i.h.bf16 %v4919_v45  ;;  %v4920_v47 = vunpack.i.l.bf16 %v4919_v45  ;;  %v1878_v45 = vld [vmem:[%s5992_s7 + $0x40] sm:$0xff] }
 0xf51   :  { %v4647_v39 = vpack.c.bf16 %v4921_v46, %v4920_v47  ;;  %v1879_v46 = vld [vmem:[%s5992_s7 + $0x48] sm:$0xff] }
 0xf52   :  { %v4697_v47 = vpack.c.bf16 %v1879_v46, %v1878_v45 }
 0xf53   :  { %4648 = vmatpush3.bf16.msra.mxu0 %v4647_v39  ;;  %v1880_v39 = vld [vmem:[%s5992_s7 + $0x50] sm:$0xff] }
 0xf54   :  { %4650 = vmatprep.subr.bf16.mxu0 %v4649_v53 }
 0xf55   :  { %v5053_v48 = vpop.eup %5052 }
 0xf56   :  { %v1655_v49 = vmul.f32 %v5053_v48, %v1653_v31 }
 0xf58   :  { %v1656_v50 = vsub.f32 2.0, %v1655_v49 }
 0xf5a   :  { %v1657_v51 = vmul.f32 %v5053_v48, %v1656_v50  ;;  %v1881_v48 = vld [vmem:[%s5992_s7 + $0x58] sm:$0xff]  ;;  %v1882_v50 = vld [vmem:[%s5992_s7 + $0x60] sm:$0xff] }
 0xf5b   :  { %v4701_v49 = vpack.c.bf16 %v1881_v48, %v1880_v39 }
 0xf5c   :  { %v1658_v54 = vmul.f32 %v5051_v43, %v1657_v51  ;;  %v1876_v43 = vld [vmem:[%s5992_s7 + $0x30] sm:$0xff]  ;;  %v1883_v51 = vld [vmem:[%s5992_s7 + $0x68] sm:$0xff] }
 0xf5d   :  { %v4693_v31 = vpack.c.bf16 %v1877_v44, %v1876_v43 }
 0xf5e   :  { %4309 = vmatmul.mubr.msk.f32.vlgmr.msra.gmra.mrb[20].mxu0 %vm423_vm3, %v1658_v54  ;;  %v4705_v54 = vpack.c.bf16 %v1883_v51, %v1882_v50 }
 0xf5f   :  { %4652 = vmatpush3.bf16.msra.mxu0 %v4649_v53  ;;  %v4925_v53 = vunpack.i.l.bf16 %v4924_v37 }
 0xf60   :  { %4654 = vmatprep.subr.bf16.mxu0 %v4653_v63 }
 0xf63   :  { %4656 = vmatpush3.bf16.msra.mxu0 %v4653_v63  ;;  %v4930_v63 = vunpack.i.l.bf16 %v4929_v2 }
 0xf64   :  { %4658 = vmatprep.subr.bf16.mxu0 %v4657_v58 }
 0xf67   :  { %4660 = vmatpush3.bf16.msra.mxu0 %v4657_v58 }
 0xf68   :  { %4662 = vmatprep.subr.bf16.mxu0 %v4661_v7 }
 0xf6b   :  { %4664 = vmatpush3.bf16.msra.mxu0 %v4661_v7  ;;  %v1763_v7 = vsel %vm52_vm0, %v5446_v22, %v4926_v55  ;;  %v4719_v22 = vpack.c.bf16 %v2009_v21, %v2006_v18 }
 0xf6c   :  { %4666 = vmatprep.subr.bf16.mxu0 %v4665_v9  ;;  %v1766_v11 = vsel %vm1764_vm4, %v1763_v7, %v4931_v60 }
 0xf6f   :  { %4668 = vmatpush3.bf16.msra.mxu0 %v4665_v9  ;;  %v1762_v9 = vsel %vm52_vm0, %v5405_v27, %v4925_v53  ;;  %v1884_v27 = vld [vmem:[%s5992_s7 + $0x70] sm:$0xff] }
 0xf70   :  { %4670 = vmatprep.subr.bf16.mxu0 %v4669_v12  ;;  %v1765_v10 = vsel %vm1764_vm4, %v1762_v9, %v4930_v63 }
 0xf73   :  { %4672 = vmatpush3.bf16.msra.mxu0 %v4669_v12  ;;  %v4715_v12 = vpack.c.bf16 %v2003_v56, %v2000_v23 }
 0xf74   :  { %4674 = vmatprep.subr.bf16.mxu0 %v4673_v17 }
 0xf77   :  { %4676 = vmatpush3.bf16.msra.mxu0 %v4673_v17  ;;  %v4717_v17 = vpack.c.bf16 %v2010_v4, %v2007_v3 }
 0xf78   :  { %4678 = vmatprep.subr.bf16.mxu0 %v4677_v24 }
 0xf7b   :  { %4680 = vmatpush3.bf16.msra.mxu0 %v4677_v24  ;;  %v1885_v24 = vld [vmem:[%s5992_s7 + $0x78] sm:$0xff] }
 0xf7c   :  { %4714 = vmatprep.subr.bf16.mxu0 %v4713_v30  ;;  %v4709_v26 = vpack.c.bf16 %v1885_v24, %v1884_v27  ;;  %v2005_v30 = vld [vmem:[#allocation3 + $0x88] sm:$0xff] }
0x1031   :  { %v1734_v1 = vpop.f32.mrb[20].mxu0 }
0x1032   :  { %v4932_v32 = vpack.i.bf16 %v1734_v1, %v5431_v52  ;;  %v4310_v33 = vpop.f32.mrb[21].mxu0  ;;  %v1873_v52 = vld [vmem:[%s5992_s7 + $0x18] sm:$0xff]  ;;  %v4721_v1 = vpack.c.bf16 %v2005_v30, %v2002_v28 }
0x1033   :  { %v4685_v0 = vpack.c.bf16 %v1873_v52, %v1872_v57  ;;  %v2011_v52 = vld [vmem:[#allocation3 + $0xb8] sm:$0xff] }
0x1034   :  { %4933 = vrot.lane.b32.xlu0 %v4932_v32, %s5160_s14  ;;  %v3918_v32 = vld [vmem:[%s5991_s6] ss:$0 sm:$0xff]  ;;  %v4725_v40 = vpack.c.bf16 %v2011_v52, %v2008_v61 }
0x1035   :  { %4686 = vmatprep.subr.bf16.mxu1 %v4685_v0 }
0x1036   :  { %4688 = vmatpush3.bf16.msra.mxu1 %v4685_v0 }
0x1037   :  { %4690 = vmatprep.subr.bf16.mxu1 %v4689_v42 }
0x103a   :  { %4692 = vmatpush3.bf16.msra.mxu1 %v4689_v42  ;;  %v3922_v42 = vld [vmem:[%s5989_s4 + $0x3] sm:$0x7] }
0x103b   :  { %4694 = vmatprep.subr.bf16.mxu1 %v4693_v31  ;;  %v2022_v45 = vrot.slane %v3922_v42, %v150_v20 }
0x103e   :  { %4696 = vmatpush3.bf16.msra.mxu1 %v4693_v31  ;;  %v2018_v31 = vrot.slane %v3922_v42, %v146_v16 }
0x103f   :  { %4698 = vmatprep.subr.bf16.mxu1 %v4697_v47 }
0x1042   :  { %4700 = vmatpush3.bf16.msra.mxu1 %v4697_v47 }
0x1043   :  { %4702 = vmatprep.subr.bf16.mxu1 %v4701_v49 }
0x1046   :  { %4704 = vmatpush3.bf16.msra.mxu1 %v4701_v49 }
0x1047   :  { %4706 = vmatprep.subr.bf16.mxu1 %v4705_v54 }
0x104a   :  { %4708 = vmatpush3.bf16.msra.mxu1 %v4705_v54 }
0x104b   :  { %4710 = vmatprep.subr.bf16.mxu1 %v4709_v26 }
0x104e   :  { %4712 = vmatpush3.bf16.msra.mxu1 %v4709_v26 }
0x104f   :  { %4722 = vmatprep.subr.bf16.mxu1 %v4721_v1 }
0x10a6   :  { %v4934_v58 = vpop.permute.xlu0 %4933 }
0x10a7   :  { %v4936_v8 = vunpack.i.h.bf16 %v4934_v58  ;;  %v4935_v29 = vunpack.i.l.bf16 %v4934_v58 }
0x10a9   :  { %v1768_v41 = vsel %vm1767_vm5, %v1765_v10, %v4935_v29  ;;  %v1769_v14 = vsel %vm1767_vm5, %v1766_v11, %v4936_v8  ;;  %v5678_v8 = vld [vmem:[%s5993_s8] ss:$0 sm:$0xff]  ;;  %v2026_v11 = vrot.slane %v3922_v42, %v154_v19 }
0x10aa   :  { %4343 = vmatprep.mubr.f32.mxu0 %v1768_v41 }
0x10ab   :  { %4344 = vmatmul.mubr.f32.vlgmr.msra.gmra.mrb[22].mxu0 %v1769_v14 }
0x10ac   :  { %4716 = vmatpush1.bf16.msra.mxu0 %v4715_v12  ;;  %2094 = vmatprep.mubr.f32.mxu0 %v5157_v25 }
0x10ad   :  { %4718 = vmatprep.subr.bf16.mxu0 %v4717_v17 }
0x10b0   :  { %4720 = vmatpush1.bf16.msra.mxu0 %v4719_v22 }
0x10b1   :  { %4736 = vmatprep.subr.bf16.mxu0 %v5158_v6 }
0x10b3   :  { %3923 = vmatmul.mubr.msk.f32.vlgmr.msra.gmra.mrb[24].mxu0 %vm52_vm0, %v5260_v59 }
0x10b4   :  { %2099 = vmatprep.mubr.f32.mxu0 %v5157_v25 }
0x10b7   :  { %3924 = vmatmul.mubr.msk.f32.gmra.mrb[26].mxu0 %vm52_vm0, %v5268_v62 }
0x10b8   :  { %2105 = vmatprep.mubr.f32.mxu0 %v5157_v25 }
0x10bb   :  { %3925 = vmatmul.mubr.msk.f32.gmra.mrb[28].mxu0 %vm52_vm0, %v5275_v5 }
0x10bc   :  { %2110 = vmatprep.mubr.f32.mxu0 %v5157_v25 }
0x10bf   :  { %3926 = vmatmul.mubr.msk.f32.gmra.mrb[30].mxu0 %vm52_vm0, %v5284_v13 }
0x10c0   :  { %4413 = vmatprep.mubr.msk.f32.mxu0 %vm5159_vm1, %v5157_v25 }
0x117e   :  { %v4345_v33 = vpop.f32.mrb[22].mxu0 }
0x117f   :  { %v1865_v34 = vadd.f32 %v4345_v33, %v3918_v32  ;;  %v1859_v36 = vpop.f32.mrb[23].mxu0 }
0x1180   :  { %v1860_v57 = vadd.f32 %v3918_v32, %v1859_v36 }
0x1181   :  { %v1869_v38 = vmax.f32 %v1865_v34, 0.0 }
0x1182   :  { %v1868_v0 = vmax.f32 %v1860_v57, 0.0 }
0x1184   :  { %4378 = vmatprep.mubr.f32.mxu1 %v1868_v0 }
0x1185   :  { %4379 = vmatmul.mubr.f32.vlgmr.msra.gmra.mrb[22].mxu1 %v1869_v38 }
0x1186   :  { %v2096_v43 = vpop.f32.mrb[24].mxu0  ;;  %4724 = vmatpush3.bf16.msra.mxu1 %v4721_v1  ;;  %4389 = vmatprep.mubr.msk.f32.mxu1 %vm52_vm0, %v5260_v59 }
0x1187   :  { %v2097_v44 = vpop.f32.mrb[25].mxu0  ;;  %4726 = vmatprep.subr.bf16.mxu1 %v4725_v40 }
0x1188   :  { %v2098_v48 = vadd.f32 %v2097_v44, %v2022_v45 }
0x118a   :  { %v2101_v46 = vpop.f32.mrb[26].mxu0  ;;  %4728 = vmatpush3.bf16.msra.mxu1 %v4725_v40 }
0x118b   :  { %v5623_v47 = vadd.f32 %v2101_v46, %v2018_v31  ;;  %v2103_v39 = vpop.f32.mrb[27].mxu0  ;;  %4729 = vmatprep.subr.bf16.mxu1 %v5158_v6 }
0x118c   :  { %v2104_v49 = vadd.f32 %v2103_v39, %v2022_v45 }
0x118d   :  { %2369 = vrot.lane.b32.xlu0 %v5623_v47, %s5160_s14  ;;  %4390 = vmatmul.mubr.msk.f32.vlgmr.msra.gmra.mrb[24].mxu1 %vm52_vm0, %v5268_v62 }
0x118e   :  { %v4730_v59 = vpack.c.bf16 %v2104_v49, %v2098_v48  ;;  %v2107_v16 = vpop.f32.mrb[28].mxu0  ;;  %4392 = vmatprep.mubr.msk.f32.mxu1 %vm52_vm0, %v5275_v5  ;;  %v5632_v20 = vpack.i.bf16 %v2104_v49, %v2098_v48 }
0x118f   :  { %v2108_v50 = vpop.f32.mrb[29].mxu0 }
0x1190   :  { %v5634_v51 = vadd.f32 %v2108_v50, %v2022_v45  ;;  %4938 = vrot.lane.b32.xlu1 %v5632_v20, %s5160_s14 }
0x1191   :  { %2547 = vrot.lane.b32.xlu0 %v5623_v47, %s5161_s15  ;;  %4393 = vmatmul.mubr.msk.f32.gmra.mrb[26].mxu1 %vm52_vm0, %v5284_v13 }
0x1192   :  { %v2112_v62 = vpop.f32.mrb[30].mxu0  ;;  %4399 = vmatprep.mubr.msk.f32.mxu1 %vm5159_vm1, %v5157_v25 }
0x1193   :  { %v5644_v54 = vadd.f32 %v2112_v62, %v2018_v31  ;;  %v2114_v5 = vpop.f32.mrb[31].mxu0  ;;  %4732 = vmatpush3.bf16.xpose.msk.msra.mxu1 %vm5314_vm2, %v4730_v59 }
0x1194   :  { %v5648_v37 = vadd.f32 %v2114_v5, %v2022_v45  ;;  %4943 = vrot.lane.b32.xlu1 %v5632_v20, %s5161_s15  ;;  %4733 = vmatprep.subr.bf16.mxu1 %v5158_v6 }
0x1196   :  { %v4758_v13 = vpack.c.bf16 %v5648_v37, %v5634_v51  ;;  %v5657_v2 = vpack.i.bf16 %v5648_v37, %v5634_v51 }
0x119a   :  { %4400 = vmatmul.mubr.msk.f32.vlgmr.msra.gmra.mrb[28].mxu1 %vm52_vm0, %v5623_v47 }
0x119b   :  { %4406 = vmatprep.mubr.msk.f32.mxu1 %vm5159_vm1, %v5157_v25 }
0x11ff   :  { %v2370_v3 = vpop.permute.xlu0 %2369 }
0x1202   :  { %v4939_v55 = vpop.permute.xlu1 %4938 }
0x1203   :  { %v4941_v53 = vunpack.i.h.bf16 %v4939_v55  ;;  %v4940_v60 = vunpack.i.l.bf16 %v4939_v55  ;;  %v2548_v7 = vpop.permute.xlu0 %2547 }
0x1205   :  { %v4737_v63 = vpack.c.bf16 %v4941_v53, %v4940_v60 }
0x1206   :  { %v4944_v23 = vpop.permute.xlu1 %4943 }
0x1207   :  { %4739 = vmatpush3.bf16.xpose.msk.msra.mxu0 %vm5314_vm2, %v4737_v63  ;;  %v4946_v56 = vunpack.i.h.bf16 %v4944_v23  ;;  %v4945_v58 = vunpack.i.l.bf16 %v4944_v23 }
0x1208   :  { %4743 = vmatprep.subr.bf16.mxu0 %v5158_v6 }
0x1209   :  { %v4744_v4 = vpack.c.bf16 %v4946_v56, %v4945_v58 }
0x120e   :  { %4414 = vmatmul.mubr.msk.f32.vlgmr.msra.gmra.mrb[32].mxu0 %vm52_vm0, %v2370_v3 }
0x120f   :  { %4746 = vmatpush3.bf16.xpose.msk.msra.mxu0 %vm5314_vm2, %v4744_v4  ;;  %4427 = vmatprep.mubr.msk.f32.mxu0 %vm5159_vm1, %v5157_v25 }
0x1210   :  { %4754 = vmatprep.subr.bf16.mxu0 %v5158_v6 }
0x1216   :  { %4428 = vmatmul.mubr.msk.f32.vlgmr.msra.gmra.mrb[34].mxu0 %vm52_vm0, %v2548_v7 }
0x1217   :  { %4448 = vmatprep.mubr.msk.f32.mxu0 %vm5159_vm1, %v5157_v25 }
0x1258   :  { %v4380_v29 = vpop.f32.mrb[22].mxu1 }
0x1259   :  { %v5681_v9 = vadd.f32 %v4380_v29, %v5678_v8  ;;  %v5683_v10 = vpop.f32.mrb[23].mxu1 }
0x1260   :  { %v4391_v12 = vpop.f32.mrb[24].mxu1 }
0x1261   :  { %v2189_v41 = vadd.f32 %v4391_v12, %v2026_v11  ;;  %v2183_v14 = vpop.f32.mrb[25].mxu1 }
0x1262   :  { %v2184_v17 = vadd.f32 %v2183_v14, %v2026_v11 }
0x1264   :  { %v4394_v18 = vpop.f32.mrb[26].mxu1  ;;  %v4734_v21 = vpack.c.bf16 %v2189_v41, %v2184_v17  ;;  %v5687_v22 = vpack.i.bf16 %v2189_v41, %v2184_v17 }
0x1265   :  { %v5689_v27 = vadd.f32 %v4394_v18, %v2026_v11  ;;  %v2193_v24 = vpop.f32.mrb[27].mxu1 }
0x1266   :  { %v5691_v26 = vadd.f32 %v2193_v24, %v2026_v11  ;;  %4735 = vmatpush3.bf16.msra.mxu1 %v4734_v21 }
0x1267   :  { %4740 = vmatprep.subr.bf16.mxu1 %v5158_v6 }
0x1268   :  { %v4762_v15 = vpack.c.bf16 %v5689_v27, %v5691_v26  ;;  %v5698_v19 = vpack.i.bf16 %v5689_v27, %v5691_v26 }
0x126d   :  { %v2277_v28 = vpop.f32.mrb[28].mxu1 }
0x126e   :  { %v2281_v30 = vmul.f32 0.17677669, %v2277_v28  ;;  %v4401_v1 = vpop.f32.mrb[29].mxu1 }
0x1270   :  { %v2282_v32 = vsel %vm423_vm3, %v2281_v30, -inf }
0x1271   :  { %2283 = vmax.xlane.f32.xlu1 %v2282_v32 }
0x12e1   :  { %v2447_v33 = vpop.f32.mrb[32].mxu0 }
0x12e2   :  { %v2451_v34 = vmul.f32 0.17677669, %v2447_v33  ;;  %v4415_v36 = vpop.f32.mrb[33].mxu0 }
0x12e4   :  { %v2452_v57 = vsel %vm423_vm3, %v2451_v34, -inf }
0x12e5   :  { %2453 = vmax.xlane.f32.xlu0 %v2452_v57 }
0x12e9   :  { %v2625_v61 = vpop.f32.mrb[34].mxu0 }
0x12ea   :  { %v2629_v52 = vmul.f32 0.17677669, %v2625_v61  ;;  %v4429_v0 = vpop.f32.mrb[35].mxu0 }
0x12ec   :  { %v2630_v38 = vsel %vm423_vm3, %v2629_v52, -inf }
0x12ed   :  { %2631 = vmax.xlane.f32.xlu0 %v2630_v38 }
0x12fe   :  { %v2284_v40 = vpop.xlane.xlu1 %2283 }
0x12ff   :  { %v2285_v42 = vsub.f32 %v2281_v30, %v2284_v40 }
0x1301   :  { %v2286_v43 = vmul.f32 1.442695, %v2285_v42 }
0x1303   :  { %5054 = vpow2.f32 %v2286_v43 }
0x130d   :  { %v5055_v44 = vpop.eup %5054 }
0x130e   :  { %v2288_v31 = vsel %vm423_vm3, %v5055_v44, 0.0 }
0x130f   :  { %2289 = vadd.xlane.f32.xlu0 %v2288_v31 }
0x1372   :  { %v2454_v45 = vpop.xlane.xlu0 %2453 }
0x1373   :  { %v2455_v46 = vsub.f32 %v2451_v34, %v2454_v45 }
0x1375   :  { %v2456_v39 = vmul.f32 1.442695, %v2455_v46 }
0x1377   :  { %5056 = vpow2.f32 %v2456_v39 }
0x137a   :  { %v2632_v48 = vpop.xlane.xlu0 %2631 }
0x137b   :  { %v2633_v49 = vsub.f32 %v2629_v52, %v2632_v48 }
0x137d   :  { %v2634_v59 = vmul.f32 1.442695, %v2633_v49 }
0x137f   :  { %5058 = vpow2.f32 %v2634_v59 }
0x1381   :  { %v5057_v16 = vpop.eup %5056 }
0x1382   :  { %v2458_v50 = vsel %vm423_vm3, %v5057_v16, 0.0 }
0x1383   :  { %2459 = vadd.xlane.f32.xlu1 %v2458_v50 }
0x1389   :  { %v5059_v62 = vpop.eup %5058 }
0x138a   :  { %v2636_v5 = vsel %vm423_vm3, %v5059_v62, 0.0 }
0x138b   :  { %2637 = vadd.xlane.f32.xlu0 %v2636_v5 }
0x1394   :  { %4948 = vrot.lane.b32.xlu1 %v5687_v22, %s5160_s14 }
0x1398   :  { %4958 = vrot.lane.b32.xlu1 %v5632_v20, %s5162_s16 }
0x139c   :  { %v2290_v55 = vpop.xlane.xlu0 %2289  ;;  %2723 = vrot.lane.b32.xlu1 %v5623_v47, %s5162_s16 }
0x139d   :  { %5060 = vrcp.f32 %v2290_v55 }
0x13a1   :  { %4953 = vrot.lane.b32.xlu0 %v5687_v22, %s5161_s15 }
0x13a7   :  { %v5061_v53 = vpop.eup %5060 }
0x13a8   :  { %v2292_v60 = vmul.f32 %v5061_v53, %v2290_v55 }
0x13aa   :  { %v2293_v63 = vsub.f32 2.0, %v2292_v60 }
0x13ac   :  { %v2294_v23 = vmul.f32 %v5061_v53, %v2293_v63 }
0x13ae   :  { %v2295_v56 = vmul.f32 %v5055_v44, %v2294_v23 }
0x13b0   :  { %4407 = vmatmul.mubr.msk.f32.vlgmr.msra.gmra.mrb[30].mxu1 %vm423_vm3, %v2295_v56 }
0x13b1   :  { %4420 = vmatprep.mubr.msk.f32.mxu1 %vm5159_vm1, %v5157_v25 }
0x1410   :  { %v2460_v58 = vpop.xlane.xlu1 %2459 }
0x1411   :  { %5062 = vrcp.f32 %v2460_v58 }
0x1414   :  { %v4949_v20 = vpop.permute.xlu1 %4948 }
0x1415   :  { %v4951_v3 = vunpack.i.h.bf16 %v4949_v20  ;;  %v4950_v4 = vunpack.i.l.bf16 %v4949_v20 }
0x1417   :  { %v4741_v47 = vpack.c.bf16 %v4951_v3, %v4950_v4 }
0x1418   :  { %v2638_v7 = vpop.xlane.xlu0 %2637  ;;  %v4959_v1 = vpop.permute.xlu1 %4958 }
0x1419   :  { %5064 = vrcp.f32 %v2638_v7  ;;  %4742 = vmatpush3.bf16.msra.mxu1 %v4741_v47  ;;  %v4961_v34 = vunpack.i.h.bf16 %v4959_v1  ;;  %v4960_v36 = vunpack.i.l.bf16 %v4959_v1 }
0x141a   :  { %4747 = vmatprep.subr.bf16.mxu1 %v5158_v6 }
0x141b   :  { %v5063_v29 = vpop.eup %5062  ;;  %v4751_v61 = vpack.c.bf16 %v4961_v34, %v4960_v36 }
0x141c   :  { %v2462_v11 = vmul.f32 %v5063_v29, %v2460_v58  ;;  %v4954_v12 = vpop.permute.xlu0 %4953  ;;  %v2724_v52 = vpop.permute.xlu1 %2723 }
0x141d   :  { %v4956_v14 = vunpack.i.h.bf16 %v4954_v12  ;;  %v4955_v17 = vunpack.i.l.bf16 %v4954_v12 }
0x141e   :  { %v2463_v41 = vsub.f32 2.0, %v2462_v11 }
0x141f   :  { %v4748_v28 = vpack.c.bf16 %v4956_v14, %v4955_v17 }
0x1420   :  { %v2464_v18 = vmul.f32 %v5063_v29, %v2463_v41 }
0x1422   :  { %v2465_v21 = vmul.f32 %v5057_v16, %v2464_v18 }
0x1423   :  { %v5065_v24 = vpop.eup %5064 }
0x1424   :  { %v2640_v30 = vmul.f32 %v5065_v24, %v2638_v7  ;;  %4421 = vmatmul.mubr.msk.f32.vlgmr.msra.gmra.mrb[32].mxu1 %vm423_vm3, %v2465_v21 }
0x1425   :  { %4749 = vmatpush3.bf16.msra.mxu1 %v4748_v28  ;;  %4434 = vmatprep.mubr.msk.f32.mxu1 %vm5159_vm1, %v5157_v25 }
0x1426   :  { %v2641_v32 = vsub.f32 2.0, %v2640_v30  ;;  %4750 = vmatprep.subr.bf16.mxu1 %v5158_v6 }
0x1428   :  { %v2642_v33 = vmul.f32 %v5065_v24, %v2641_v32 }
0x142a   :  { %v2643_v57 = vmul.f32 %v5059_v62, %v2642_v33 }
0x142c   :  { %4435 = vmatmul.mubr.msk.f32.vlgmr.msra.gmra.mrb[34].mxu1 %vm423_vm3, %v2643_v57 }
0x142d   :  { %4441 = vmatprep.mubr.msk.f32.mxu1 %vm5159_vm1, %v5157_v25 }
0x142e   :  { %4753 = vmatpush3.bf16.xpose.msk.msra.mxu1 %vm5314_vm2, %v4751_v61 }
0x142f   :  { %4761 = vmatprep.subr.bf16.mxu1 %v5158_v6 }
0x1435   :  { %4442 = vmatmul.mubr.msk.f32.vlgmr.msra.gmra.mrb[36].mxu1 %vm52_vm0, %v2724_v52 }
0x1436   :  { %4763 = vmatpush3.bf16.msra.mxu1 %v4762_v15  ;;  %4462 = vmatprep.mubr.msk.f32.mxu1 %vm5159_vm1, %v5157_v25 }
0x1437   :  { %4764 = vmatprep.subr.bf16.mxu1 %v5158_v6 }
0x1483   :  { %v5735_v0 = vpop.f32.mrb[30].mxu1 }
0x1484   :  { %v4408_v38 = vpop.f32.mrb[31].mxu1 }
0x14f7   :  { %v5737_v40 = vpop.f32.mrb[32].mxu1 }
0x14f8   :  { %v4422_v42 = vpop.f32.mrb[33].mxu1 }
0x14ff   :  { %v5739_v43 = vpop.f32.mrb[34].mxu1 }
0x1500   :  { %v4436_v44 = vpop.f32.mrb[35].mxu1 }
0x1508   :  { %v2801_v31 = vpop.f32.mrb[36].mxu1 }
0x1509   :  { %v2805_v45 = vmul.f32 0.17677669, %v2801_v31  ;;  %v4443_v46 = vpop.f32.mrb[37].mxu1 }
0x150b   :  { %v2806_v27 = vsel %vm423_vm3, %v2805_v45, -inf }
0x150c   :  { %2807 = vmax.xlane.f32.xlu1 %v2806_v27 }
0x1599   :  { %v2808_v26 = vpop.xlane.xlu1 %2807 }
0x159a   :  { %v2809_v15 = vsub.f32 %v2805_v45, %v2808_v26 }
0x159c   :  { %v2810_v39 = vmul.f32 1.442695, %v2809_v15 }
0x159e   :  { %5066 = vpow2.f32 %v2810_v39 }
0x15a8   :  { %v5067_v48 = vpop.eup %5066 }
0x15a9   :  { %v2812_v49 = vsel %vm423_vm3, %v5067_v48, 0.0 }
0x15aa   :  { %2813 = vadd.xlane.f32.xlu0 %v2812_v49 }
0x15c0   :  { %4963 = vrot.lane.b32.xlu0 %v5687_v22, %s5162_s16 }
0x15c4   :  { %3066 = vrot.lane.b32.xlu0 %v5644_v54, %s5160_s14 }
0x1637   :  { %v2814_v59 = vpop.xlane.xlu0 %2813 }
0x1638   :  { %5068 = vrcp.f32 %v2814_v59 }
0x163b   :  { %v4964_v16 = vpop.permute.xlu0 %4963 }
0x163c   :  { %v4966_v50 = vunpack.i.h.bf16 %v4964_v16  ;;  %v4965_v62 = vunpack.i.l.bf16 %v4964_v16 }
0x163e   :  { %v4755_v5 = vpack.c.bf16 %v4966_v50, %v4965_v62 }
0x163f   :  { %v3067_v30 = vpop.permute.xlu0 %3066 }
0x1640   :  { %4756 = vmatpush3.bf16.msra.mxu0 %v4755_v5 }
0x1641   :  { %4757 = vmatprep.subr.bf16.mxu0 %v5158_v6 }
0x1642   :  { %v5069_v55 = vpop.eup %5068 }
0x1643   :  { %v2816_v53 = vmul.f32 %v5069_v55, %v2814_v59 }
0x1645   :  { %v2817_v60 = vsub.f32 2.0, %v2816_v53 }
0x1647   :  { %v2818_v63 = vmul.f32 %v5069_v55, %v2817_v60 }
0x1649   :  { %v2819_v23 = vmul.f32 %v5067_v48, %v2818_v63 }
0x164b   :  { %4449 = vmatmul.mubr.msk.f32.vlgmr.msra.gmra.mrb[36].mxu0 %vm423_vm3, %v2819_v23 }
0x164c   :  { %4760 = vmatpush3.bf16.xpose.msk.msra.mxu0 %vm5314_vm2, %v4758_v13  ;;  %4455 = vmatprep.mubr.msk.f32.mxu0 %vm5159_vm1, %v5157_v25 }
0x164d   :  { %4768 = vmatprep.subr.bf16.mxu0 %v5158_v6 }
0x1653   :  { %4456 = vmatmul.mubr.msk.f32.vlgmr.msra.gmra.mrb[38].mxu0 %vm52_vm0, %v5644_v54 }
0x1654   :  { %4476 = vmatprep.mubr.msk.f32.mxu0 %vm5159_vm1, %v5157_v25 }
0x171e   :  { %v5761_v22 = vpop.f32.mrb[36].mxu0 }
0x171f   :  { %v4450_v56 = vpop.f32.mrb[37].mxu0 }
0x1726   :  { %v2974_v58 = vpop.f32.mrb[38].mxu0 }
0x1727   :  { %v2978_v20 = vmul.f32 0.17677669, %v2974_v58  ;;  %v4457_v51 = vpop.f32.mrb[39].mxu0 }
0x1729   :  { %v2979_v37 = vsel %vm423_vm3, %v2978_v20, -inf }
0x172a   :  { %2980 = vmax.xlane.f32.xlu1 %v2979_v37 }
0x17b7   :  { %v2981_v13 = vpop.xlane.xlu1 %2980 }
0x17b8   :  { %v2982_v3 = vsub.f32 %v2978_v20, %v2981_v13 }
0x17ba   :  { %v2983_v4 = vmul.f32 1.442695, %v2982_v3 }
0x17bc   :  { %5070 = vpow2.f32 %v2983_v4 }
0x17c6   :  { %v5071_v47 = vpop.eup %5070 }
0x17c7   :  { %v2985_v7 = vsel %vm423_vm3, %v5071_v47, 0.0 }
0x17c8   :  { %2986 = vadd.xlane.f32.xlu1 %v2985_v7 }
0x17d9   :  { %4968 = vrot.lane.b32.xlu1 %v5657_v2, %s5160_s14 }
0x1855   :  { %v2987_v29 = vpop.xlane.xlu1 %2986 }
0x1856   :  { %5072 = vrcp.f32 %v2987_v29 }
0x1859   :  { %v4969_v41 = vpop.permute.xlu1 %4968 }
0x185a   :  { %v4971_v17 = vunpack.i.h.bf16 %v4969_v41  ;;  %v4970_v18 = vunpack.i.l.bf16 %v4969_v41 }
0x185c   :  { %v4765_v28 = vpack.c.bf16 %v4971_v17, %v4970_v18 }
0x1860   :  { %v5073_v11 = vpop.eup %5072 }
0x1861   :  { %v2989_v12 = vmul.f32 %v5073_v11, %v2987_v29 }
0x1863   :  { %v2990_v14 = vsub.f32 2.0, %v2989_v12 }
0x1865   :  { %v2991_v21 = vmul.f32 %v5073_v11, %v2990_v14 }
0x1867   :  { %v2992_v24 = vmul.f32 %v5071_v47, %v2991_v21 }
0x1869   :  { %4463 = vmatmul.mubr.msk.f32.vlgmr.msra.gmra.mrb[38].mxu1 %vm423_vm3, %v2992_v24 }
0x186a   :  { %4767 = vmatpush3.bf16.xpose.msk.msra.mxu1 %vm5314_vm2, %v4765_v28  ;;  %4469 = vmatprep.mubr.msk.f32.mxu1 %vm5159_vm1, %v5157_v25 }
0x186b   :  { %4775 = vmatprep.subr.bf16.mxu1 %v5158_v6 }
0x1871   :  { %4470 = vmatmul.mubr.msk.f32.vlgmr.msra.gmra.mrb[40].mxu1 %vm52_vm0, %v3067_v30 }
0x1872   :  { %4490 = vmatprep.mubr.msk.f32.mxu1 %vm5159_vm1, %v5157_v25 }
0x193c   :  { %v5776_v1 = vpop.f32.mrb[38].mxu1 }
0x193d   :  { %v4464_v32 = vpop.f32.mrb[39].mxu1 }
0x1944   :  { %v3144_v33 = vpop.f32.mrb[40].mxu1 }
0x1945   :  { %v3148_v34 = vmul.f32 0.17677669, %v3144_v33  ;;  %v4471_v36 = vpop.f32.mrb[41].mxu1 }
0x1946   :  { %v1960_v36 = vadd.f32 %v5678_v8, %v5683_v10 }
0x1947   :  { %v3149_v57 = vsel %vm423_vm3, %v3148_v34, -inf }
0x1948   :  { %3150 = vmax.xlane.f32.xlu0 %v3149_v57  ;;  %v3920_v57 = vmul.f32 -1.442695, %v1960_v36 }
0x195e   :  { %4973 = vrot.lane.b32.xlu0 %v5698_v19, %s5160_s14 }
0x1962   :  { %3244 = vrot.lane.b32.xlu0 %v5644_v54, %s5161_s15 }
0x19d5   :  { %v3151_v61 = vpop.xlane.xlu0 %3150 }
0x19d6   :  { %v3152_v52 = vsub.f32 %v3148_v34, %v3151_v61 }
0x19d8   :  { %v3153_v38 = vmul.f32 1.442695, %v3152_v52 }
0x19d9   :  { %v4974_v42 = vpop.permute.xlu0 %4973 }
0x19da   :  { %5074 = vpow2.f32 %v3153_v38  ;;  %v4976_v44 = vunpack.i.h.bf16 %v4974_v42  ;;  %v4975_v31 = vunpack.i.l.bf16 %v4974_v42 }
0x19dc   :  { %v4769_v45 = vpack.c.bf16 %v4976_v44, %v4975_v31 }
0x19dd   :  { %v3245_v55 = vpop.permute.xlu0 %3244 }
0x19de   :  { %4770 = vmatpush3.bf16.msra.mxu0 %v4769_v45 }
0x19df   :  { %4771 = vmatprep.subr.bf16.mxu0 %v5158_v6 }
0x19e4   :  { %v5075_v46 = vpop.eup %5074 }
0x19e5   :  { %v3155_v27 = vsel %vm423_vm3, %v5075_v46, 0.0 }
0x19e6   :  { %3156 = vadd.xlane.f32.xlu1 %v3155_v27 }
0x19f7   :  { %4978 = vrot.lane.b32.xlu1 %v5657_v2, %s5161_s15 }
0x1a73   :  { %v3157_v26 = vpop.xlane.xlu1 %3156 }
0x1a74   :  { %5076 = vrcp.f32 %v3157_v26 }
0x1a77   :  { %v4979_v48 = vpop.permute.xlu1 %4978 }
0x1a78   :  { %v4981_v59 = vunpack.i.h.bf16 %v4979_v48  ;;  %v4980_v16 = vunpack.i.l.bf16 %v4979_v48 }
0x1a7a   :  { %v4772_v5 = vpack.c.bf16 %v4981_v59, %v4980_v16  ;;  %v5102_v16 = vld [vmem:[%s5986_s1] sm:$0xff] }
0x1a7e   :  { %v5077_v15 = vpop.eup %5076 }
0x1a7f   :  { %v3159_v39 = vmul.f32 %v5077_v15, %v3157_v26 }
0x1a81   :  { %v3160_v49 = vsub.f32 2.0, %v3159_v39 }
0x1a83   :  { %v3161_v50 = vmul.f32 %v5077_v15, %v3160_v49 }
0x1a85   :  { %v3162_v62 = vmul.f32 %v5075_v46, %v3161_v50 }
0x1a87   :  { %4477 = vmatmul.mubr.msk.f32.vlgmr.msra.gmra.mrb[40].mxu0 %vm423_vm3, %v3162_v62 }
0x1a88   :  { %4774 = vmatpush3.bf16.xpose.msk.msra.mxu0 %vm5314_vm2, %v4772_v5  ;;  %4483 = vmatprep.mubr.msk.f32.mxu0 %vm5159_vm1, %v5157_v25 }
0x1a89   :  { %4782 = vmatprep.subr.bf16.mxu0 %v5158_v6 }
0x1a8f   :  { %4484 = vmatmul.mubr.msk.f32.vlgmr.msra.gmra.mrb[42].mxu0 %vm52_vm0, %v3245_v55 }
0x1a90   :  { %4504 = vmatprep.mubr.msk.f32.mxu0 %vm5159_vm1, %v5157_v25 }
0x1b5a   :  { %v5796_v53 = vpop.f32.mrb[40].mxu0 }
0x1b5b   :  { %v4997_v60 = vpack.i.bf16 %v5796_v53, %v5737_v40  ;;  %v4478_v63 = vpop.f32.mrb[41].mxu0 }
0x1b62   :  { %v3322_v23 = vpop.f32.mrb[42].mxu0 }
0x1b63   :  { %v3326_v56 = vmul.f32 0.17677669, %v3322_v23  ;;  %v4485_v58 = vpop.f32.mrb[43].mxu0 }
0x1b65   :  { %v3327_v20 = vsel %vm423_vm3, %v3326_v56, -inf }
0x1b66   :  { %3328 = vmax.xlane.f32.xlu1 %v3327_v20 }
0x1b77   :  { %4988 = vrot.lane.b32.xlu1 %v5657_v2, %s5162_s16 }
0x1b7b   :  { %3420 = vrot.lane.b32.xlu1 %v5644_v54, %s5162_s16 }
0x1bf3   :  { %v3329_v51 = vpop.xlane.xlu1 %3328 }
0x1bf4   :  { %v3330_v37 = vsub.f32 %v3326_v56, %v3329_v51 }
0x1bf6   :  { %v3331_v13 = vmul.f32 1.442695, %v3330_v37 }
0x1bf7   :  { %v4989_v12 = vpop.permute.xlu1 %4988 }
0x1bf8   :  { %5078 = vpow2.f32 %v3331_v13  ;;  %v4991_v17 = vunpack.i.h.bf16 %v4989_v12  ;;  %v4990_v18 = vunpack.i.l.bf16 %v4989_v12  ;;  %v3969_v12 = vld [vmem:[%s5990_s5 + $0xb0] sm:$0xff] }
0x1bfa   :  { %v4779_v28 = vpack.c.bf16 %v4991_v17, %v4990_v18  ;;  %v3971_v17 = vld [vmem:[%s5990_s5 + $0xc0] sm:$0xff]  ;;  %v3972_v18 = vld [vmem:[%s5990_s5 + $0xc8] sm:$0xff] }
0x1bfb   :  { %v3421_v30 = vpop.permute.xlu1 %3420 }
0x1c02   :  { %v5079_v3 = vpop.eup %5078 }
0x1c03   :  { %v3333_v4 = vsel %vm423_vm3, %v5079_v3, 0.0 }
0x1c04   :  { %3334 = vadd.xlane.f32.xlu0 %v3333_v4  ;;  %v3965_v4 = vld [vmem:[%s5990_s5 + $0x90] sm:$0xff] }
0x1c1a   :  { %4983 = vrot.lane.b32.xlu0 %v5698_v19, %s5161_s15 }
0x1c91   :  { %v3335_v47 = vpop.xlane.xlu0 %3334 }
0x1c92   :  { %5080 = vrcp.f32 %v3335_v47 }
0x1c93   :  { %5082 = vpow2.f32 %v3920_v57  ;;  %v3977_v57 = vld [vmem:[%s5990_s5 + $0xf0] sm:$0xff] }
0x1c95   :  { %v4984_v7 = vpop.permute.xlu0 %4983 }
0x1c96   :  { %v4986_v29 = vunpack.i.h.bf16 %v4984_v7  ;;  %v4985_v11 = vunpack.i.l.bf16 %v4984_v7  ;;  %v3966_v7 = vld [vmem:[%s5990_s5 + $0x98] sm:$0xff] }
0x1c98   :  { %v4776_v2 = vpack.c.bf16 %v4986_v29, %v4985_v11  ;;  %v4789_v29 = vpack.c.bf16 %v3966_v7, %v3965_v4  ;;  %v3967_v11 = vld [vmem:[%s5990_s5 + $0xa0] sm:$0xff]  ;;  %v3995_v4 = vld [vmem:[%s5992_s7 + $0xf0] sm:$0xff] }
0x1c9a   :  { %4777 = vmatpush3.bf16.msra.mxu1 %v4776_v2  ;;  %v3968_v2 = vld [vmem:[%s5990_s5 + $0xa8] sm:$0xff] }
0x1c9b   :  { %4778 = vmatprep.subr.bf16.mxu1 %v5158_v6  ;;  %v5163_v6 = vmov 32  }
0x1c9c   :  { %v5081_v54 = vpop.eup %5080  ;;  %5012 = vset.pattern.permute.xlu0 %v5163_v6  ;;  %5013 = vset.pattern.permute.xlu1 %v5163_v6  ;;  %v3975_v6 = vld [vmem:[%s5990_s5 + $0xe0] sm:$0xff] }
0x1c9d   :  { %v3337_v41 = vmul.f32 %v5081_v54, %v3335_v47  ;;  %v5083_v38 = vpop.eup %5082 }
0x1c9e   :  { %v1974_v42 = vadd.f32 1.0, %v5083_v38 }
0x1c9f   :  { %v3338_v14 = vsub.f32 2.0, %v3337_v41  ;;  %v3970_v41 = vld [vmem:[%s5990_s5 + $0xb8] sm:$0xff] }
0x1ca0   :  { %5084 = vrcp.f32 %v1974_v42 }
0x1ca1   :  { %v3339_v21 = vmul.f32 %v5081_v54, %v3338_v14  ;;  %v4793_v54 = vpack.c.bf16 %v3968_v2, %v3967_v11  ;;  %v4797_v14 = vpack.c.bf16 %v3970_v41, %v3969_v12  ;;  %v3998_v12 = vld [vmem:[%s5993_s8 + $0x1] ss:$0 sm:$0xff] }
0x1ca3   :  { %v3340_v24 = vmul.f32 %v5079_v3, %v3339_v21  ;;  %v4801_v21 = vpack.c.bf16 %v3972_v18, %v3971_v17 }
0x1ca5   :  { %4491 = vmatmul.mubr.msk.f32.vlgmr.msra.gmra.mrb[42].mxu1 %vm423_vm3, %v3340_v24  ;;  %v3973_v24 = vld [vmem:[%s5990_s5 + $0xd0] sm:$0xff] }
0x1ca6   :  { %4781 = vmatpush3.bf16.xpose.msk.msra.mxu1 %vm5314_vm2, %v4779_v28  ;;  %4497 = vmatprep.mubr.msk.f32.mxu1 %vm5159_vm1, %v5157_v25  ;;  %v3974_v28 = vld [vmem:[%s5990_s5 + $0xd8] sm:$0xff] }
0x1caa   :  { %v5085_v44 = vpop.eup %5084 }
0x1cad   :  { %4498 = vmatmul.mubr.msk.f32.vlgmr.msra.gmra.mrb[44].mxu1 %vm52_vm0, %v3421_v30  ;;  %v4805_v30 = vpack.c.bf16 %v3974_v28, %v3973_v24 }
0x1d78   :  { %v3416_v32 = vpop.f32.mrb[42].mxu1 }
0x1d79   :  { %v5002_v33 = vpack.i.bf16 %v3416_v32, %v5739_v43  ;;  %v4492_v34 = vpop.f32.mrb[43].mxu1  ;;  %v5824_v43 = vstv %s5985_s0  ;;  %v3976_v32 = vld [vmem:[%s5990_s5 + $0xe8] sm:$0xff] }
0x1d7a   :  { %v1981_v8 = vmul.f32 %v5085_v44, %v5824_v43  ;;  %v3921_v34 = vmul.f32 -1.442695, %v5681_v9 }
0x1d80   :  { %v3498_v61 = vpop.f32.mrb[44].mxu1 }
0x1d81   :  { %v3502_v35 = vmul.f32 0.17677669, %v3498_v61  ;;  %v4499_v52 = vpop.f32.mrb[45].mxu1  ;;  %v3978_v61 = vld [vmem:[%s5990_s5 + $0xf8] sm:$0xff] }
0x1d82   :  { %v4813_v52 = vpack.c.bf16 %v3978_v61, %v3977_v57 }
0x1d83   :  { %v3503_v25 = vsel %vm423_vm3, %v3502_v35, -inf }
0x1d84   :  { %3504 = vmax.xlane.f32.xlu0 %v3503_v25 }
0x1d9a   :  { %4993 = vrot.lane.b32.xlu0 %v5698_v19, %s5162_s16 }
0x1d9e   :  { %5003 = vrot.lane.b32.xlu0 %v5002_v33, %s5161_s15  ;;  %v4809_v33 = vpack.c.bf16 %v3976_v32, %v3975_v6 }
0x1da2   :  { %1985 = vperm.xlu0 %5012, %v1981_v8  }
0x1e11   :  { %v3505_v10 = vpop.xlane.xlu0 %3504 }
0x1e12   :  { %v3506_v31 = vsub.f32 %v3502_v35, %v3505_v10  ;;  %v3981_v10 = vld [vmem:[%s5992_s7 + $0x80] sm:$0xff] }
0x1e14   :  { %v3507_v45 = vmul.f32 1.442695, %v3506_v31  ;;  %v3982_v31 = vld [vmem:[%s5992_s7 + $0x88] sm:$0xff] }
0x1e15   :  { %v4994_v46 = vpop.permute.xlu0 %4993 }
0x1e16   :  { %5086 = vpow2.f32 %v3507_v45  ;;  %v4996_v27 = vunpack.i.h.bf16 %v4994_v46  ;;  %v4995_v26 = vunpack.i.l.bf16 %v4994_v46  ;;  %v3983_v45 = vld [vmem:[%s5992_s7 + $0x90] sm:$0xff]  ;;  %v3984_v46 = vld [vmem:[%s5992_s7 + $0x98] sm:$0xff] }
0x1e18   :  { %v4783_v15 = vpack.c.bf16 %v4996_v27, %v4995_v26  ;;  %v4821_v27 = vpack.c.bf16 %v3984_v46, %v3983_v45  ;;  %v3985_v26 = vld [vmem:[%s5992_s7 + $0xa0] sm:$0xff] }
0x1e19   :  { %v5004_v19 = vpop.permute.xlu0 %5003 }
0x1e1a   :  { %4784 = vmatpush3.bf16.msra.mxu0 %v4783_v15  ;;  %v5006_v23 = vunpack.i.h.bf16 %v5004_v19  ;;  %v5005_v56 = vunpack.i.l.bf16 %v5004_v19  ;;  %v3986_v15 = vld [vmem:[%s5992_s7 + $0xa8] sm:$0xff] }
0x1e1b   :  { %v4825_v19 = vpack.c.bf16 %v3986_v15, %v3985_v26 }
0x1e20   :  { %v5087_v39 = vpop.eup %5086 }
0x1e21   :  { %v1986_v48 = vpop.permute.xlu0 %1985  ;;  %v3509_v49 = vsel %vm423_vm3, %v5087_v39, 0.0 }
0x1e22   :  { %v1993_v59 = vmul.f32 %v1986_v48, %v1960_v36  ;;  %3510 = vadd.xlane.f32.xlu1 %v3509_v49  ;;  %v3988_v48 = vld [vmem:[%s5992_s7 + $0xb8] sm:$0xff] }
0x1e24   :  { %v1995_v50 = vadd.f32 %v5102_v16, %v1993_v59  ;;  %v3989_v59 = vld [vmem:[%s5992_s7 + $0xc0] sm:$0xff]  ;;  %v3990_v16 = vld [vmem:[%s5992_s7 + $0xc8] sm:$0xff] }
0x1e26   :  { %1996 = vst.msk [vmem:[#allocation6] sm:$0xff] %vm52_vm0, %v1995_v50  ;;  %v4833_v50 = vpack.c.bf16 %v3990_v16, %v3989_v59 }
0x1e33   :  { %4998 = vrot.lane.b32.xlu1 %v4997_v60, %s5162_s16 }
0x1eaf   :  { %v3511_v62 = vpop.xlane.xlu1 %3510 }
0x1eb0   :  { %5088 = vrcp.f32 %v3511_v62 }
0x1eb1   :  { %5090 = vpow2.f32 %v3921_v34 }
0x1eb3   :  { %v4999_v5 = vpop.permute.xlu1 %4998 }
0x1eb4   :  { %v5001_v55 = vunpack.i.h.bf16 %v4999_v5  ;;  %v5000_v63 = vunpack.i.l.bf16 %v4999_v5  ;;  %v3992_v5 = vld [vmem:[%s5992_s7 + $0xd8] sm:$0xff] }
0x1eb6   :  { %v3621_v58 = vsel %vm52_vm0, %v5776_v1, %v5001_v55  ;;  %v3620_v20 = vsel %vm52_vm0, %v5735_v0, %v5000_v63  ;;  %v3963_v1 = vld [vmem:[%s5990_s5 + $0x80] sm:$0xff]  ;;  %v3964_v0 = vld [vmem:[%s5990_s5 + $0x88] sm:$0xff] }
0x1eb7   :  { %v5842_v51 = vsel %vm1764_vm4, %v3620_v20, %v5005_v56  ;;  %v5845_v37 = vsel %vm1764_vm4, %v3621_v58, %v5006_v23  ;;  %v4785_v47 = vpack.c.bf16 %v3964_v0, %v3963_v1  ;;  %v3993_v63 = vld [vmem:[%s5992_s7 + $0xe0] sm:$0xff]  ;;  %v3994_v23 = vld [vmem:[%s5992_s7 + $0xe8] sm:$0xff]  ;;  %v5103_v1 = vld [vmem:[%s5986_s1 + $0x10] sm:$0xff] }
0x1eb8   :  { %v4841_v56 = vpack.c.bf16 %v3994_v23, %v3993_v63 }
0x1eb9   :  { %4786 = vmatprep.subr.bf16.mxu0 %v4785_v47 }
0x1eba   :  { %v5089_v40 = vpop.eup %5088 }
0x1ebb   :  { %v3513_v53 = vmul.f32 %v5089_v40, %v3511_v62  ;;  %v5091_v36 = vpop.eup %5090  ;;  %v3991_v62 = vld [vmem:[%s5992_s7 + $0xd0] sm:$0xff] }
0x1ebc   :  { %v1975_v35 = vadd.f32 1.0, %v5091_v36  ;;  %v4837_v55 = vpack.c.bf16 %v3992_v5, %v3991_v62 }
0x1ebd   :  { %v3514_v60 = vsub.f32 2.0, %v3513_v53 }
0x1ebe   :  { %5092 = vrcp.f32 %v1975_v35 }
0x1ebf   :  { %v3515_v13 = vmul.f32 %v5089_v40, %v3514_v60 }
0x1ec1   :  { %v3516_v3 = vmul.f32 %v5087_v39, %v3515_v13  ;;  %v3987_v39 = vld [vmem:[%s5992_s7 + $0xb0] sm:$0xff] }
0x1ec2   :  { %v4829_v49 = vpack.c.bf16 %v3988_v48, %v3987_v39 }
0x1ec3   :  { %4505 = vmatmul.mubr.msk.f32.vlgmr.msra.gmra.mrb[44].mxu0 %vm423_vm3, %v3516_v3 }
0x1ec4   :  { %4788 = vmatpush3.bf16.msra.mxu0 %v4785_v47 }
0x1ec5   :  { %4790 = vmatprep.subr.bf16.mxu0 %v4789_v29 }
0x1ec8   :  { %4792 = vmatpush3.bf16.msra.mxu0 %v4789_v29  ;;  %v5093_v44 = vpop.eup %5092 }
0x1ec9   :  { %4794 = vmatprep.subr.bf16.mxu0 %v4793_v54  ;;  %v1982_v8 = vmul.f32 %v5093_v44, %v5824_v43  ;;  %v5105_v44 = vld [vmem:[%s5986_s1 + $0x8] sm:$0xff] }
0x1ecc   :  { %4796 = vmatpush3.bf16.msra.mxu0 %v4793_v54 }
0x1ecd   :  { %4798 = vmatprep.subr.bf16.mxu0 %v4797_v14 }
0x1ed0   :  { %4800 = vmatpush3.bf16.msra.mxu0 %v4797_v14 }
0x1ed1   :  { %4802 = vmatprep.subr.bf16.mxu0 %v4801_v21 }
0x1ed4   :  { %4804 = vmatpush3.bf16.msra.mxu0 %v4801_v21 }
0x1ed5   :  { %4806 = vmatprep.subr.bf16.mxu0 %v4805_v30 }
0x1ed8   :  { %4808 = vmatpush3.bf16.msra.mxu0 %v4805_v30 }
0x1ed9   :  { %4810 = vmatprep.subr.bf16.mxu0 %v4809_v33 }
0x1edc   :  { %4812 = vmatpush3.bf16.msra.mxu0 %v4809_v33 }
0x1edd   :  { %4814 = vmatprep.subr.bf16.mxu0 %v4813_v52 }
0x1ee0   :  { %4816 = vmatpush3.bf16.msra.mxu0 %v4813_v52 }
0x1f96   :  { %v3592_v25 = vpop.f32.mrb[44].mxu0 }
0x1f97   :  { %v5007_v38 = vpack.i.bf16 %v3592_v25, %v5761_v22  ;;  %v4506_v42 = vpop.f32.mrb[45].mxu0  ;;  %v4817_v22 = vpack.c.bf16 %v3982_v31, %v3981_v10 }
0x1f99   :  { %5008 = vrot.lane.b32.xlu1 %v5007_v38, %s5160_s14  ;;  %4818 = vmatprep.subr.bf16.mxu1 %v4817_v22  ;;  %v5104_v38 = vld [vmem:[%s5986_s1 + $0x18] sm:$0xff] }
0x1f9a   :  { %4820 = vmatpush3.bf16.msra.mxu1 %v4817_v22 }
0x1f9b   :  { %4822 = vmatprep.subr.bf16.mxu1 %v4821_v27 }
0x1f9d   :  { %1990 = vperm.xlu1 %5013, %v1982_v8  }
0x1f9e   :  { %4824 = vmatpush3.bf16.msra.mxu1 %v4821_v27 }
0x1f9f   :  { %4826 = vmatprep.subr.bf16.mxu1 %v4825_v19 }
0x1fa2   :  { %4828 = vmatpush3.bf16.msra.mxu1 %v4825_v19 }
0x1fa3   :  { %4830 = vmatprep.subr.bf16.mxu1 %v4829_v49 }
0x1fa6   :  { %4832 = vmatpush3.bf16.msra.mxu1 %v4829_v49 }
0x1fa7   :  { %4834 = vmatprep.subr.bf16.mxu1 %v4833_v50 }
0x1faa   :  { %4836 = vmatpush3.bf16.msra.mxu1 %v4833_v50 }
0x1fab   :  { %4838 = vmatprep.subr.bf16.mxu1 %v4837_v55 }
0x1fae   :  { %4840 = vmatpush3.bf16.msra.mxu1 %v4837_v55 }
0x1faf   :  { %4842 = vmatprep.subr.bf16.mxu1 %v4841_v56 }
0x1fb2   :  { %4844 = vmatpush3.bf16.msra.mxu1 %v4841_v56 }
0x200b   :  { %v5009_v58 = vpop.permute.xlu1 %5008 }
0x200c   :  { %v5011_v20 = vunpack.i.h.bf16 %v5009_v58  ;;  %v5010_v40 = vunpack.i.l.bf16 %v5009_v58 }
0x200e   :  { %v3624_v53 = vsel %vm1767_vm5, %v5842_v51, %v5010_v40  ;;  %v3625_v60 = vsel %vm1767_vm5, %v5845_v37, %v5011_v20  ;;  %v3996_v51 = vld [vmem:[%s5992_s7 + $0xf8] sm:$0xff] }
0x200f   :  { %4539 = vmatprep.mubr.f32.mxu0 %v3624_v53  ;;  %v4845_v37 = vpack.c.bf16 %v3996_v51, %v3995_v4 }
0x2010   :  { %4540 = vmatmul.mubr.f32.vlgmr.msra.gmra.mrb[46].mxu0 %v3625_v60 }
0x2011   :  { %4846 = vmatprep.subr.bf16.mxu1 %v4845_v37 }
0x2012   :  { %4848 = vmatpush3.bf16.msra.mxu1 %v4845_v37 }
0x201c   :  { %v1991_v13 = vpop.permute.xlu1 %1990 }
0x201d   :  { %v1994_v3 = vmul.f32 %v1991_v13, %v5681_v9  ;;  %v3980_v9 = vld [vmem:[%s5991_s6 + $0x1] ss:$0 sm:$0xff]  ;;  %s5164_s6 = smov [#allocation6]  }
0x201e   :  { %s3863_s7 = sshll.u32 %s5164_s6, 4  ;;  %s3864_s7 = int_to_ptr.vmem [resolvable:$true] %s3863_s7 }
0x201f   :  { %v1997_v0 = vadd.f32 %v5103_v1, %v1994_v3  ;;  %s5128_s27 = scalar_lea.vmem %s3864_s7, 512  ;;  %p5133_p9 = scmp.lt.s32.totalorder %s3864_s7, %s3864_s7 }
0x2020   :  { %p5129_p8 = scmp.ne.s32.totalorder %s3864_s7, %s5128_s27  ;;  %p5134_p10 = scmp.lt.s32.totalorder %s5128_s27, %s5128_s27 }
0x2021   :  { %1998 = vst.msk [vmem:[#allocation6 + $0x10] sm:$0xff] %vm52_vm0, %v1997_v0 }
0x2022   :  { %p5135_p11 = por %p5134_p10, %p5133_p9 }
0x2024   :  { %p5136_p12 = pnand %p5135_p11, %p5129_p8 }
0x20e3   :  { %v4541_v47 = vpop.f32.mrb[46].mxu0 }
0x20e4   :  { %v3723_v7 = vadd.f32 %v4541_v47, %v3980_v9  ;;  %v3717_v29 = vpop.f32.mrb[47].mxu0 }
0x20e5   :  { %v3718_v11 = vadd.f32 %v3980_v9, %v3717_v29 }
0x20e6   :  { %v3727_v54 = vmax.f32 %v3723_v7, 0.0 }
0x20e7   :  { %v3726_v2 = vmax.f32 %v3718_v11, 0.0 }
0x20e9   :  { %4574 = vmatprep.mubr.f32.mxu1 %v3726_v2 }
0x20ea   :  { %4575 = vmatmul.mubr.f32.vlgmr.msra.gmra.mrb[46].mxu1 %v3727_v54 }
0x21bd   :  { %v4576_v41 = vpop.f32.mrb[46].mxu1 }
0x21be   :  { %v3825_v14 = vadd.f32 %v4576_v41, %v3998_v12  ;;  %v3819_v17 = vpop.f32.mrb[47].mxu1 }
0x21bf   :  { %v3820_v18 = vadd.f32 %v3998_v12, %v3819_v17 }
0x21c0   :  { %v4000_v21 = vmul.f32 -1.442695, %v3825_v14 }
0x21c1   :  { %v3999_v24 = vmul.f32 -1.442695, %v3820_v18 }
0x21c2   :  { %5094 = vpow2.f32 %v4000_v21 }
0x21c3   :  { %5096 = vpow2.f32 %v3999_v24 }
0x21cc   :  { %v5095_v28 = vpop.eup %5094 }
0x21cd   :  { %v5097_v30 = vpop.eup %5096  ;;  %v3835_v6 = vadd.f32 1.0, %v5095_v28 }
0x21ce   :  { %v3834_v32 = vadd.f32 1.0, %v5097_v30 }
0x21cf   :  { %5098 = vrcp.f32 %v3835_v6 }
0x21d0   :  { %5100 = vrcp.f32 %v3834_v32 }
0x21d9   :  { %v5099_v33 = vpop.eup %5098 }
0x21da   :  { %v5101_v34 = vpop.eup %5100  ;;  %v3841_v36 = vmul.f32 %v5099_v33, %v5824_v43 }
0x21db   :  { %v3840_v57 = vmul.f32 %v5101_v34, %v5824_v43 }
0x21dc   :  { %3849 = vperm.xlu0 %5012, %v3841_v36  }
0x21dd   :  { %3844 = vperm.xlu1 %5013, %v3840_v57  }
0x225b   :  { %v3850_v61 = vpop.permute.xlu0 %3849 }
0x225c   :  { %v3853_v35 = vmul.f32 %v3850_v61, %v3825_v14  ;;  %v3845_v52 = vpop.permute.xlu1 %3844 }
0x225d   :  { %v3852_v25 = vmul.f32 %v3845_v52, %v3820_v18 }
0x225e   :  { %v3856_v42 = vadd.f32 %v5104_v38, %v3853_v35 }
0x225f   :  { %v3854_v8 = vadd.f32 %v5105_v44, %v3852_v25 }
0x2260   :  { %3857 = vst.msk [vmem:[#allocation6 + $0x18] sm:$0xff] %vm52_vm0, %v3856_v42 }
0x2261   :  { %3855 = vst.msk [vmem:[#allocation6 + $0x8] sm:$0xff] %vm52_vm0, %v3854_v8 }
0x2262   :  { %5139 = shalt.err (!%p5136_p12)
}
0x2263   :  { %s5140_s16 = scalar_lea.hbm %s5994_s9, 512 }
0x2264   :  { %p5141_p13 = scmp.ne.s32.totalorder %s5994_s9, %s5140_s16  ;;  %p5144_p0 = scmp.lt.u32.totalorder %s5140_s16, %s5994_s9 }
0x2266   :  { %p5146_p1 = pnand %p5144_p0, %p5141_p13 }
0x2268   :  { %5149 = shalt.err (!%p5146_p1)
}
0x2269   :  { %s5165_s30 = smov 128   ;;  %s5166_s10 = smov 8  }
0x226a   :  { %3869 = dma.vmem_to_hbm [thread:$0]  %s3864_s7, 512, %s5994_s9, [#allocation5], %s5165_s30, %s5165_s30, %s5166_s10  }
0x226b   :  { %5152 = dma.done.wait [#allocation5], 512  }
0x226c   :  { %5153 = vsyncadd [#allocation5], 4294966784 }
0x226d   :  { %3873 = vsyncpa [#allocation4], 1 }
0x226e   :  { %3874 = vsyncpa [#allocation5], 1 }

</bundles_post_ra>
